<compile_context>
chip_gen: v5e
topology: v5e:2x2
jax: 0.10.0
libtpu: 0.0.40
codegen_flags: <defaults>
</compile_context>

<pallas_src>
import functools

import jax
import jax.numpy as jnp
from jax.experimental import pallas as pl
from jax.experimental.pallas import tpu as pltpu


IN_FEATURES = 784
HIDDEN = 500
OUT_FEATURES = 10

HIDDEN_PAD = 512   # 500 -> 512 (4 x 128 lanes)
OUT_PAD = 128      # 10  -> 128 (1 x 128 lanes)


def mlp_kernel(x_ref, w1_ref, b1_ref, w2_ref, b2_ref, o_ref):
    # Layer 1: x @ W1 + b1, ReLU  (MXU matmul, f32 accumulation, VPU relu)
    h = jnp.dot(x_ref[...], w1_ref[...], preferred_element_type=jnp.float32)
    h = jnp.maximum(h + b1_ref[...], 0.0)          # (TB,512) + (1,512)
    # Layer 2: h @ W2 + b2  (padded K=512, N=128 -> clean MXU tiles)
    out = jnp.dot(h, w2_ref[...], preferred_element_type=jnp.float32)
    o_ref[...] = (out + b2_ref[...]).astype(o_ref.dtype)


def _round_up(n, m):
    return ((n + m - 1) // m) * m


@functools.partial(jax.jit, static_argnames=("tb",))
def mlp_forward(x, w1, b1, w2, b2, *, tb=256):
    """x: (B, 784); w1: (784, 500); b1: (500,); w2: (500, 10); b2: (10,).

    Returns (B, 10) logits, identical math to the PyTorch module.
    """
    B = x.shape[0]
    dtype = x.dtype

    # --- zero-pad weights/biases to lane-aligned shapes (exact math) --------
    w1p = jnp.zeros((IN_FEATURES, HIDDEN_PAD), dtype).at[:, :HIDDEN].set(w1)
    b1p = jnp.zeros((1, HIDDEN_PAD), dtype).at[0, :HIDDEN].set(b1)
    w2p = jnp.zeros((HIDDEN_PAD, OUT_PAD), dtype).at[:HIDDEN, :OUT_FEATURES].set(w2)
    b2p = jnp.zeros((1, OUT_PAD), dtype).at[0, :OUT_FEATURES].set(b2)

    # --- batch tiling: pad B up to a multiple of the tile size --------------
    TB = tb if B >= tb else _round_up(B, 8)        # sublane-aligned small tiles
    B_pad = _round_up(B, TB)
    if B_pad != B:
        x = jnp.pad(x, ((0, B_pad - B), (0, 0)))
    grid = (B_pad // TB,)

    flops = 2 * B_pad * (IN_FEATURES * HIDDEN_PAD + HIDDEN_PAD * OUT_PAD)
    bytes_accessed = 4 * (x.size + w1p.size + b1p.size + w2p.size + b2p.size
                          + B_pad * OUT_PAD)

    out = pl.pallas_call(
        mlp_kernel,
        out_shape=jax.ShapeDtypeStruct((B_pad, OUT_PAD), dtype),
        grid=grid,
        in_specs=[
            # activations: stream one batch tile per grid step
            pl.BlockSpec((TB, IN_FEATURES), lambda i: (i, 0)),
            # weights/biases: constant block index -> stay VMEM-resident
            pl.BlockSpec((IN_FEATURES, HIDDEN_PAD), lambda i: (0, 0)),
            pl.BlockSpec((1, HIDDEN_PAD), lambda i: (0, 0)),
            pl.BlockSpec((HIDDEN_PAD, OUT_PAD), lambda i: (0, 0)),
            pl.BlockSpec((1, OUT_PAD), lambda i: (0, 0)),
        ],
        out_specs=pl.BlockSpec((TB, OUT_PAD), lambda i: (i, 0)),
        compiler_params=pltpu.CompilerParams(
            dimension_semantics=("parallel",)),
        cost_estimate=pl.CostEstimate(
            flops=flops, transcendentals=0, bytes_accessed=bytes_accessed),
    )(x, w1p, b1p, w2p, b2p)

    # drop batch padding and the zero-padded output lanes
    return out[:B, :OUT_FEATURES]


def init_params(key):
    """Deterministic init mirroring nn.Linear: U(-1/sqrt(fan_in), 1/sqrt(fan_in)).

    Weights are stored transposed relative to PyTorch, i.e. (in, out), so the
    kernel computes x @ W (== x @ W_torch.T).
    """
    k1, k2, k3, k4 = jax.random.split(key, 4)
    lim1 = 1.0 / jnp.sqrt(jnp.float32(IN_FEATURES))
    lim2 = 1.0 / jnp.sqrt(jnp.float32(HIDDEN))
    w1 = jax.random.uniform(k1, (IN_FEATURES, HIDDEN), jnp.float32, -lim1, lim1)
    b1 = jax.random.uniform(k2, (HIDDEN,), jnp.float32, -lim1, lim1)
    w2 = jax.random.uniform(k3, (HIDDEN, OUT_FEATURES), jnp.float32, -lim2, lim2)
    b2 = jax.random.uniform(k4, (OUT_FEATURES,), jnp.float32, -lim2, lim2)
    return w1, b1, w2, b2


if __name__ == "__main__":
    key = jax.random.PRNGKey(0)
    kx, kp = jax.random.split(key)

    batch = 8
    x = jax.random.normal(kx, (batch, IN_FEATURES), jnp.float32)
    w1, b1, w2, b2 = init_params(kp)

    y = mlp_forward(x, w1, b1, w2, b2)
    y = jax.block_until_ready(y)

    # Pure-JAX reference of the same (unpadded) math.
    ref = jnp.maximum(x @ w1 + b1[None, :], 0.0) @ w2 + b2[None, :]
    assert y.shape == (batch, OUT_FEATURES), y.shape
    assert jnp.allclose(y, ref, atol=1e-4, rtol=1e-4), float(
        jnp.max(jnp.abs(y - ref)))

    print("KERNEL_OK")
</pallas_src>

<mosaic_0001>
module attributes {stable_mosaic.version = 11 : i64} {
  func.func @mlp_kernel(%arg0: i32, %arg1: memref<8x784xf32, #tpu.memory_space<vmem>>, %arg2: memref<784x512xf32, #tpu.memory_space<vmem>>, %arg3: memref<1x512xf32, #tpu.memory_space<vmem>>, %arg4: memref<512x128xf32, #tpu.memory_space<vmem>>, %arg5: memref<1x128xf32, #tpu.memory_space<vmem>>, %arg6: memref<8x128xf32, #tpu.memory_space<vmem>>) attributes {dimension_semantics = [#tpu.dimension_semantics<parallel>], iteration_bounds = array<i64: 1>, scalar_prefetch = 0 : i64, scratch_operands = 0 : i64, tpu.core_type = #tpu.core_type<tc>, window_params = [{transform_indices = @transform_0, window_bounds = array<i64: 8, 784>}, {pipeline_mode = #tpu.pipeline_mode<synchronous>, transform_indices = @transform_1, window_bounds = array<i64: 784, 512>}, {pipeline_mode = #tpu.pipeline_mode<synchronous>, transform_indices = @transform_2, window_bounds = array<i64: 1, 512>}, {pipeline_mode = #tpu.pipeline_mode<synchronous>, transform_indices = @transform_3, window_bounds = array<i64: 512, 128>}, {pipeline_mode = #tpu.pipeline_mode<synchronous>, transform_indices = @transform_4, window_bounds = array<i64: 1, 128>}, {transform_indices = @transform_5, window_bounds = array<i64: 8, 128>}]} {
    %c0 = arith.constant 0 : index
    %c0_0 = arith.constant 0 : index
    %0 = vector.load %arg1[%c0, %c0_0] : memref<8x784xf32, #tpu.memory_space<vmem>>, vector<8x784xf32>
    %c0_1 = arith.constant 0 : index
    %c0_2 = arith.constant 0 : index
    %1 = vector.load %arg2[%c0_1, %c0_2] : memref<784x512xf32, #tpu.memory_space<vmem>>, vector<784x512xf32>
    %cst = arith.constant dense<0.000000e+00> : vector<8x512xf32>
    %2 = tpu.matmul %0, %1, %cst {dimension_numbers = #tpu.dot_dimension_numbers<[1], [0], [0], [1], [0, 0, 1, 1], [], []>} : vector<8x784xf32>, vector<784x512xf32>, vector<8x512xf32> -> vector<8x512xf32>
    %c0_3 = arith.constant 0 : index
    %c0_4 = arith.constant 0 : index
    %3 = vector.load %arg3[%c0_3, %c0_4] : memref<1x512xf32, #tpu.memory_space<vmem>>, vector<1x512xf32>
    %4 = vector.broadcast %3 : vector<1x512xf32> to vector<8x512xf32>
    %5 = arith.addf %2, %4 : vector<8x512xf32>
    %cst_5 = arith.constant 0.000000e+00 : f32
    %6 = vector.broadcast %cst_5 : f32 to vector<8x512xf32>
    %7 = arith.maximumf %5, %6 : vector<8x512xf32>
    %c0_6 = arith.constant 0 : index
    %c0_7 = arith.constant 0 : index
    %8 = vector.load %arg4[%c0_6, %c0_7] : memref<512x128xf32, #tpu.memory_space<vmem>>, vector<512x128xf32>
    %cst_8 = arith.constant dense<0.000000e+00> : vector<8x128xf32>
    %9 = tpu.matmul %7, %8, %cst_8 {dimension_numbers = #tpu.dot_dimension_numbers<[1], [0], [0], [1], [0, 0, 1, 1], [], []>} : vector<8x512xf32>, vector<512x128xf32>, vector<8x128xf32> -> vector<8x128xf32>
    %c0_9 = arith.constant 0 : index
    %c0_10 = arith.constant 0 : index
    %10 = vector.load %arg5[%c0_9, %c0_10] : memref<1x128xf32, #tpu.memory_space<vmem>>, vector<1x128xf32>
    %11 = vector.broadcast %10 : vector<1x128xf32> to vector<8x128xf32>
    %12 = arith.addf %9, %11 : vector<8x128xf32>
    %c0_11 = arith.constant 0 : index
    %c0_12 = arith.constant 0 : index
    %13 = vector.load %arg6[%c0_11, %c0_12] : memref<8x128xf32, #tpu.memory_space<vmem>>, vector<8x128xf32>
    tpu.vector_store %arg6[%c0_11, %c0_12], %12 {strides = array<i32>} : memref<8x128xf32, #tpu.memory_space<vmem>>, vector<8x128xf32>,
    return
  }
  func.func @transform_0(%arg0: i32) -> (i32, i32) {
    %c0_i32 = arith.constant 0 : i32
    %c0_i32_0 = arith.constant 0 : i32
    return %arg0, %c0_i32 : i32, i32
  }
  func.func @transform_1(%arg0: i32) -> (i32, i32) {
    %c0_i32 = arith.constant 0 : i32
    %c0_i32_0 = arith.constant 0 : i32
    %c0_i32_1 = arith.constant 0 : i32
    return %c0_i32, %c0_i32_0 : i32, i32
  }
  func.func @transform_2(%arg0: i32) -> (i32, i32) {
    %c0_i32 = arith.constant 0 : i32
    %c0_i32_0 = arith.constant 0 : i32
    %c0_i32_1 = arith.constant 0 : i32
    return %c0_i32, %c0_i32_0 : i32, i32
  }
  func.func @transform_3(%arg0: i32) -> (i32, i32) {
    %c0_i32 = arith.constant 0 : i32
    %c0_i32_0 = arith.constant 0 : i32
    %c0_i32_1 = arith.constant 0 : i32
    return %c0_i32, %c0_i32_0 : i32, i32
  }
  func.func @transform_4(%arg0: i32) -> (i32, i32) {
    %c0_i32 = arith.constant 0 : i32
    %c0_i32_0 = arith.constant 0 : i32
    %c0_i32_1 = arith.constant 0 : i32
    return %c0_i32, %c0_i32_0 : i32, i32
  }
  func.func @transform_5(%arg0: i32) -> (i32, i32) {
    %c0_i32 = arith.constant 0 : i32
    %c0_i32_0 = arith.constant 0 : i32
    return %arg0, %c0_i32 : i32, i32
  }
}

</mosaic_0001>

<bundles_post_ra>
// kernel: mlp_forward.1
= control target key start
LH: loop header
LB: loop body
LE: loop exit
PB: predicated region body
PF: predicated region fallthrough
CT: control target
= control target key end

     0   :  { %vm430_vm0 = vcmask 130048   ;;  %s2697_s0 = inlined_call_operand.vmem [shape: f32[8,784], index: 0, kind: input, shape index: {}]   ;;  %s2698_s1 = inlined_call_operand.vmem [shape: f32[784,512], index: 1, kind: input, shape index: {}]   ;;  %s2699_s2 = inlined_call_operand.vmem [shape: f32[1,512], index: 2, kind: input, shape index: {}]   ;;  %s2700_s3 = inlined_call_operand.vmem [shape: f32[512,128], index: 3, kind: input, shape index: {}]   ;;  %s2701_s4 = inlined_call_operand.vmem [shape: f32[1,128], index: 4, kind: input, shape index: {}]   ;;  %s2702_s5 = inlined_call_operand.hbm [shape: f32[8,128], index: 5, kind: output, shape index: {}]  }
   0x1   :  { %v88_v0 = vld [vmem:[%s2698_s1 + $0x1e0] sm:$0xff] }
   0x2   :  { %v152_v1 = vld [vmem:[%s2698_s1 + $0x3e0] sm:$0xff]  ;;  %434 = vmatpush.msra.mxu0 %v88_v0 }
   0x3   :  { %v280_v2 = vld [vmem:[%s2698_s1 + $0x7e0] sm:$0xff]  ;;  %454 = vmatpush.msra.mxu1 %v152_v1  ;;  %v89_v1 = vld [vmem:[%s2698_s1 + $0x1e8] sm:$0xff] }
   0x4   :  { %v84_v3 = vld [vmem:[%s2698_s1 + $0x1c0] sm:$0xff]  ;;  %494 = vmatpush.msra.mxu3 %v280_v2 }
   0x5   :  { %v148_v4 = vld [vmem:[%s2698_s1 + $0x3c0] sm:$0xff]  ;;  %435 = vmatpush.msra.mxu0 %v84_v3 }
   0x6   :  { %v216_v5 = vld [vmem:[%s2698_s1 + $0x5e0] sm:$0xff]  ;;  %455 = vmatpush.msra.mxu1 %v148_v4 }
   0x7   :  { %474 = vmatpush.msra.mxu2 %v216_v5  ;;  %v276_v6 = vld [vmem:[%s2698_s1 + $0x7c0] sm:$0xff] }
   0x8   :  { %v80_v7 = vld [vmem:[%s2698_s1 + $0x1a0] sm:$0xff]  ;;  %495 = vmatpush.msra.mxu3 %v276_v6  ;;  %v85_v6 = vld [vmem:[%s2698_s1 + $0x1c8] sm:$0xff] }
   0x9   :  { %v144_v8 = vld [vmem:[%s2698_s1 + $0x3a0] sm:$0xff]  ;;  %436 = vmatpush.msra.mxu0 %v80_v7 }
   0xa   :  { %v212_v9 = vld [vmem:[%s2698_s1 + $0x5c0] sm:$0xff]  ;;  %456 = vmatpush.msra.mxu1 %v144_v8 }
   0xb   :  { %v272_v10 = vld [vmem:[%s2698_s1 + $0x7a0] sm:$0xff]  ;;  %475 = vmatpush.msra.mxu2 %v212_v9 }
   0xc   :  { %v76_v11 = vld [vmem:[%s2698_s1 + $0x180] sm:$0xff]  ;;  %496 = vmatpush.msra.mxu3 %v272_v10  ;;  %v81_v10 = vld [vmem:[%s2698_s1 + $0x1a8] sm:$0xff] }
   0xd   :  { %v140_v12 = vld [vmem:[%s2698_s1 + $0x380] sm:$0xff]  ;;  %437 = vmatpush.msra.mxu0 %v76_v11  ;;  %v1461_v11 = vld [vmem:[%s2697_s0 + $0x10] sm:$0xff] }
   0xe   :  { %v208_v13 = vld [vmem:[%s2698_s1 + $0x5a0] sm:$0xff]  ;;  %457 = vmatpush.msra.mxu1 %v140_v12  ;;  %v153_v12 = vld [vmem:[%s2698_s1 + $0x3e8] sm:$0xff] }
   0xf   :  { %v268_v14 = vld [vmem:[%s2698_s1 + $0x780] sm:$0xff]  ;;  %476 = vmatpush.msra.mxu2 %v208_v13 }
  0x10   :  { %v204_v15 = vld [vmem:[%s2698_s1 + $0x580] sm:$0xff]  ;;  %497 = vmatpush.msra.mxu3 %v268_v14 }
  0x11   :  { %v72_v16 = vld [vmem:[%s2698_s1 + $0x160] sm:$0xff]  ;;  %477 = vmatpush.msra.mxu2 %v204_v15  ;;  %v77_v15 = vld [vmem:[%s2698_s1 + $0x188] sm:$0xff] }
  0x12   :  { %v136_v17 = vld [vmem:[%s2698_s1 + $0x360] sm:$0xff]  ;;  %438 = vmatpush.msra.mxu0 %v72_v16 }
  0x13   :  { %v264_v18 = vld [vmem:[%s2698_s1 + $0x760] sm:$0xff]  ;;  %458 = vmatpush.msra.mxu1 %v136_v17  ;;  %v1484_v17 = vld [vmem:[%s2697_s0 + $0x18] sm:$0xff] }
  0x14   :  { %v200_v19 = vld [vmem:[%s2698_s1 + $0x560] sm:$0xff]  ;;  %498 = vmatpush.msra.mxu3 %v264_v18  ;;  %v149_v18 = vld [vmem:[%s2698_s1 + $0x3c8] sm:$0xff] }
  0x15   :  { %v68_v20 = vld [vmem:[%s2698_s1 + $0x140] sm:$0xff]  ;;  %478 = vmatpush.msra.mxu2 %v200_v19 }
  0x16   :  { %v132_v21 = vld [vmem:[%s2698_s1 + $0x340] sm:$0xff]  ;;  %439 = vmatpush.msra.mxu0 %v68_v20 }
  0x17   :  { %v260_v22 = vld [vmem:[%s2698_s1 + $0x740] sm:$0xff]  ;;  %459 = vmatpush.msra.mxu1 %v132_v21  ;;  %v73_v21 = vld [vmem:[%s2698_s1 + $0x168] sm:$0xff] }
  0x18   :  { %v196_v23 = vld [vmem:[%s2698_s1 + $0x540] sm:$0xff]  ;;  %499 = vmatpush.msra.mxu3 %v260_v22  ;;  %v1503_v22 = vld [vmem:[%s2697_s0 + $0x8] sm:$0xff] }
  0x19   :  { %v64_v24 = vld [vmem:[%s2698_s1 + $0x120] sm:$0xff]  ;;  %479 = vmatpush.msra.mxu2 %v196_v23  ;;  %v145_v23 = vld [vmem:[%s2698_s1 + $0x3a8] sm:$0xff] }
  0x1a   :  { %v128_v25 = vld [vmem:[%s2698_s1 + $0x320] sm:$0xff]  ;;  %440 = vmatpush.msra.mxu0 %v64_v24 }
  0x1b   :  { %v256_v26 = vld [vmem:[%s2698_s1 + $0x720] sm:$0xff]  ;;  %460 = vmatpush.msra.mxu1 %v128_v25 }
  0x1c   :  { %v192_v27 = vld [vmem:[%s2698_s1 + $0x520] sm:$0xff]  ;;  %500 = vmatpush.msra.mxu3 %v256_v26  ;;  %v69_v26 = vld [vmem:[%s2698_s1 + $0x148] sm:$0xff] }
  0x1d   :  { %v60_v28 = vld [vmem:[%s2698_s1 + $0x100] sm:$0xff]  ;;  %480 = vmatpush.msra.mxu2 %v192_v27  ;;  %v141_v27 = vld [vmem:[%s2698_s1 + $0x388] sm:$0xff] }
  0x1e   :  { %v124_v29 = vld [vmem:[%s2698_s1 + $0x300] sm:$0xff]  ;;  %441 = vmatpush.msra.mxu0 %v60_v28 }
  0x1f   :  { %v252_v30 = vld [vmem:[%s2698_s1 + $0x700] sm:$0xff]  ;;  %461 = vmatpush.msra.mxu1 %v124_v29 }
  0x20   :  { %v188_v31 = vld [vmem:[%s2698_s1 + $0x500] sm:$0xff]  ;;  %501 = vmatpush.msra.mxu3 %v252_v30  ;;  %v65_v30 = vld [vmem:[%s2698_s1 + $0x128] sm:$0xff] }
  0x21   :  { %v56_v32 = vld [vmem:[%s2698_s1 + $0xe0] sm:$0xff]  ;;  %481 = vmatpush.msra.mxu2 %v188_v31  ;;  %v137_v31 = vld [vmem:[%s2698_s1 + $0x368] sm:$0xff] }
  0x22   :  { %v120_v33 = vld [vmem:[%s2698_s1 + $0x2e0] sm:$0xff]  ;;  %442 = vmatpush.msra.mxu0 %v56_v32 }
  0x23   :  { %v248_v34 = vld [vmem:[%s2698_s1 + $0x6e0] sm:$0xff]  ;;  %462 = vmatpush.msra.mxu1 %v120_v33 }
  0x24   :  { %v184_v35 = vld [vmem:[%s2698_s1 + $0x4e0] sm:$0xff]  ;;  %502 = vmatpush.msra.mxu3 %v248_v34  ;;  %v61_v34 = vld [vmem:[%s2698_s1 + $0x108] sm:$0xff] }
  0x25   :  { %v52_v36 = vld [vmem:[%s2698_s1 + $0xc0] sm:$0xff]  ;;  %482 = vmatpush.msra.mxu2 %v184_v35  ;;  %v133_v35 = vld [vmem:[%s2698_s1 + $0x348] sm:$0xff] }
  0x26   :  { %v116_v37 = vld [vmem:[%s2698_s1 + $0x2c0] sm:$0xff]  ;;  %443 = vmatpush.msra.mxu0 %v52_v36 }
  0x27   :  { %v244_v38 = vld [vmem:[%s2698_s1 + $0x6c0] sm:$0xff]  ;;  %463 = vmatpush.msra.mxu1 %v116_v37 }
  0x28   :  { %v180_v39 = vld [vmem:[%s2698_s1 + $0x4c0] sm:$0xff]  ;;  %503 = vmatpush.msra.mxu3 %v244_v38  ;;  %v57_v38 = vld [vmem:[%s2698_s1 + $0xe8] sm:$0xff] }
  0x29   :  { %v48_v40 = vld [vmem:[%s2698_s1 + $0xa0] sm:$0xff]  ;;  %483 = vmatpush.msra.mxu2 %v180_v39  ;;  %v129_v39 = vld [vmem:[%s2698_s1 + $0x328] sm:$0xff] }
  0x2a   :  { %v112_v41 = vld [vmem:[%s2698_s1 + $0x2a0] sm:$0xff]  ;;  %444 = vmatpush.msra.mxu0 %v48_v40 }
  0x2b   :  { %v240_v42 = vld [vmem:[%s2698_s1 + $0x6a0] sm:$0xff]  ;;  %464 = vmatpush.msra.mxu1 %v112_v41 }
  0x2c   :  { %v176_v43 = vld [vmem:[%s2698_s1 + $0x4a0] sm:$0xff]  ;;  %504 = vmatpush.msra.mxu3 %v240_v42  ;;  %v53_v42 = vld [vmem:[%s2698_s1 + $0xc8] sm:$0xff] }
  0x2d   :  { %v44_v44 = vld [vmem:[%s2698_s1 + $0x80] sm:$0xff]  ;;  %484 = vmatpush.msra.mxu2 %v176_v43  ;;  %v125_v43 = vld [vmem:[%s2698_s1 + $0x308] sm:$0xff] }
  0x2e   :  { %v108_v45 = vld [vmem:[%s2698_s1 + $0x280] sm:$0xff]  ;;  %445 = vmatpush.msra.mxu0 %v44_v44 }
  0x2f   :  { %v236_v46 = vld [vmem:[%s2698_s1 + $0x680] sm:$0xff]  ;;  %465 = vmatpush.msra.mxu1 %v108_v45 }
  0x30   :  { %v172_v47 = vld [vmem:[%s2698_s1 + $0x480] sm:$0xff]  ;;  %505 = vmatpush.msra.mxu3 %v236_v46  ;;  %v49_v46 = vld [vmem:[%s2698_s1 + $0xa8] sm:$0xff] }
  0x31   :  { %v40_v48 = vld [vmem:[%s2698_s1 + $0x60] sm:$0xff]  ;;  %485 = vmatpush.msra.mxu2 %v172_v47  ;;  %v121_v47 = vld [vmem:[%s2698_s1 + $0x2e8] sm:$0xff] }
  0x32   :  { %v104_v49 = vld [vmem:[%s2698_s1 + $0x260] sm:$0xff]  ;;  %446 = vmatpush.msra.mxu0 %v40_v48 }
  0x33   :  { %v232_v50 = vld [vmem:[%s2698_s1 + $0x660] sm:$0xff]  ;;  %466 = vmatpush.msra.mxu1 %v104_v49 }
  0x34   :  { %v168_v51 = vld [vmem:[%s2698_s1 + $0x460] sm:$0xff]  ;;  %506 = vmatpush.msra.mxu3 %v232_v50  ;;  %v45_v50 = vld [vmem:[%s2698_s1 + $0x88] sm:$0xff] }
  0x35   :  { %v36_v52 = vld [vmem:[%s2698_s1 + $0x40] sm:$0xff]  ;;  %486 = vmatpush.msra.mxu2 %v168_v51  ;;  %v117_v51 = vld [vmem:[%s2698_s1 + $0x2c8] sm:$0xff] }
  0x36   :  { %v100_v53 = vld [vmem:[%s2698_s1 + $0x240] sm:$0xff]  ;;  %447 = vmatpush.msra.mxu0 %v36_v52 }
  0x37   :  { %v228_v54 = vld [vmem:[%s2698_s1 + $0x640] sm:$0xff]  ;;  %467 = vmatpush.msra.mxu1 %v100_v53 }
  0x38   :  { %v164_v55 = vld [vmem:[%s2698_s1 + $0x440] sm:$0xff]  ;;  %507 = vmatpush.msra.mxu3 %v228_v54  ;;  %v41_v54 = vld [vmem:[%s2698_s1 + $0x68] sm:$0xff] }
  0x39   :  { %v32_v56 = vld [vmem:[%s2698_s1 + $0x20] sm:$0xff]  ;;  %487 = vmatpush.msra.mxu2 %v164_v55  ;;  %v113_v55 = vld [vmem:[%s2698_s1 + $0x2a8] sm:$0xff] }
  0x3a   :  { %v96_v57 = vld [vmem:[%s2698_s1 + $0x220] sm:$0xff]  ;;  %448 = vmatpush.msra.mxu0 %v32_v56 }
  0x3b   :  { %v224_v58 = vld [vmem:[%s2698_s1 + $0x620] sm:$0xff]  ;;  %468 = vmatpush.msra.mxu1 %v96_v57 }
  0x3c   :  { %v160_v59 = vld [vmem:[%s2698_s1 + $0x420] sm:$0xff]  ;;  %508 = vmatpush.msra.mxu3 %v224_v58  ;;  %v37_v58 = vld [vmem:[%s2698_s1 + $0x48] sm:$0xff] }
  0x3d   :  { %v28_v60 = vld [vmem:[%s2698_s1] sm:$0xff]  ;;  %488 = vmatpush.msra.mxu2 %v160_v59  ;;  %v109_v59 = vld [vmem:[%s2698_s1 + $0x288] sm:$0xff] }
  0x3e   :  { %v92_v61 = vld [vmem:[%s2698_s1 + $0x200] sm:$0xff]  ;;  %449 = vmatpush.msra.mxu0 %v28_v60 }
  0x3f   :  { %v220_v62 = vld [vmem:[%s2698_s1 + $0x600] sm:$0xff]  ;;  %469 = vmatpush.msra.mxu1 %v92_v61 }
  0x40   :  { %v344_v63 = vld [vmem:[%s2698_s1 + $0x9e0] sm:$0xff]  ;;  %509 = vmatpush.msra.mxu3 %v220_v62  ;;  %470 = vmatmul.f32.vlgmr.msra.gmra.mxu1 %v1503_v22  ;;  %v33_v62 = vld [vmem:[%s2698_s1 + $0x28] sm:$0xff] }
  0x41   :  { %v408_v0 = vld [vmem:[%s2698_s1 + $0xbe0] sm:$0xff]  ;;  %514 = vmatpush.msrb.mxu0 %v344_v63  ;;  %510 = vmatmul.f32.vlgmr.msra.gmra.mxu3 %v1484_v17  ;;  %v1629_v63 = vld [vmem:[%s2697_s0 + $0x30] sm:$0xff] }
  0x42   :  { %v156_v2 = vld [vmem:[%s2698_s1 + $0x400] sm:$0xff]  ;;  %534 = vmatpush.msrb.mxu1 %v408_v0  ;;  %574 = vmatpush.msrb.mxu3 %v89_v1  ;;  %v105_v0 = vld [vmem:[%s2698_s1 + $0x268] sm:$0xff] }
  0x43   :  { %v340_v3 = vld [vmem:[%s2698_s1 + $0x9c0] sm:$0xff]  ;;  %489 = vmatpush.msra.mxu2 %v156_v2 }
  0x44   :  { %v404_v4 = vld [vmem:[%s2698_s1 + $0xbc0] sm:$0xff]  ;;  %515 = vmatpush.msrb.mxu0 %v340_v3  ;;  %575 = vmatpush.msrb.mxu3 %v85_v6  ;;  %v29_v3 = vld [vmem:[%s2698_s1 + $0x8] sm:$0xff] }
  0x45   :  { %v416_v5 = vld [vmem:[%s2698_s1 + $0xc20] sm:$0xff]  ;;  %535 = vmatpush.msrb.mxu1 %v404_v4  ;;  %490 = vmatmul.f32.vlgmr.msra.gmra.mxu2 %v1461_v11 }
  0x46   :  { %v336_v7 = vld [vmem:[%s2698_s1 + $0x9a0] sm:$0xff]  ;;  %568 = vmatpush.msrb.mxu2 %v416_v5  ;;  %576 = vmatpush.msrb.mxu3 %v81_v10  ;;  %v101_v5 = vld [vmem:[%s2698_s1 + $0x248] sm:$0xff] }
  0x47   :  { %v400_v8 = vld [vmem:[%s2698_s1 + $0xba0] sm:$0xff]  ;;  %516 = vmatpush.msrb.mxu0 %v336_v7 }
  0x48   :  { %v412_v9 = vld [vmem:[%s2698_s1 + $0xc00] sm:$0xff]  ;;  %536 = vmatpush.msrb.mxu1 %v400_v8  ;;  %577 = vmatpush.msrb.mxu3 %v77_v15 }
  0x49   :  { %v332_v13 = vld [vmem:[%s2698_s1 + $0x980] sm:$0xff]  ;;  %569 = vmatpush.msrb.mxu2 %v412_v9 }
  0x4a   :  { %v396_v14 = vld [vmem:[%s2698_s1 + $0xb80] sm:$0xff]  ;;  %517 = vmatpush.msrb.mxu0 %v332_v13  ;;  %578 = vmatpush.msrb.mxu3 %v73_v21 }
  0x4b   :  { %v1479_v16 = vld [vmem:[%s2697_s0] sm:$0xff]  ;;  %594 = vmatpush.msra.mxu2 %v153_v12  ;;  %537 = vmatpush.msrb.mxu1 %v396_v14 }
  0x4c   :  { %v328_v19 = vld [vmem:[%s2698_s1 + $0x960] sm:$0xff]  ;;  %450 = vmatmul.f32.vlgmr.msra.gmra.mxu0 %v1479_v16  ;;  %579 = vmatpush.msrb.mxu3 %v69_v26 }
  0x4d   :  { %v392_v20 = vld [vmem:[%s2698_s1 + $0xb60] sm:$0xff]  ;;  %595 = vmatpush.msra.mxu2 %v149_v18  ;;  %518 = vmatpush.msrb.mxu0 %v328_v19 }
  0x4e   :  { %v324_v24 = vld [vmem:[%s2698_s1 + $0x940] sm:$0xff]  ;;  %538 = vmatpush.msrb.mxu1 %v392_v20  ;;  %580 = vmatpush.msrb.mxu3 %v65_v30 }
  0x4f   :  { %v388_v25 = vld [vmem:[%s2698_s1 + $0xb40] sm:$0xff]  ;;  %596 = vmatpush.msra.mxu2 %v145_v23  ;;  %519 = vmatpush.msrb.mxu0 %v324_v24 }
  0x50   :  { %v320_v28 = vld [vmem:[%s2698_s1 + $0x920] sm:$0xff]  ;;  %539 = vmatpush.msrb.mxu1 %v388_v25  ;;  %581 = vmatpush.msrb.mxu3 %v61_v34 }
  0x51   :  { %v384_v29 = vld [vmem:[%s2698_s1 + $0xb20] sm:$0xff]  ;;  %597 = vmatpush.msra.mxu2 %v141_v27  ;;  %520 = vmatpush.msrb.mxu0 %v320_v28 }
  0x52   :  { %v316_v32 = vld [vmem:[%s2698_s1 + $0x900] sm:$0xff]  ;;  %540 = vmatpush.msrb.mxu1 %v384_v29  ;;  %582 = vmatpush.msrb.mxu3 %v57_v38 }
  0x53   :  { %v380_v33 = vld [vmem:[%s2698_s1 + $0xb00] sm:$0xff]  ;;  %598 = vmatpush.msra.mxu2 %v137_v31  ;;  %521 = vmatpush.msrb.mxu0 %v316_v32 }
  0x54   :  { %v312_v36 = vld [vmem:[%s2698_s1 + $0x8e0] sm:$0xff]  ;;  %541 = vmatpush.msrb.mxu1 %v380_v33  ;;  %583 = vmatpush.msrb.mxu3 %v53_v42 }
  0x55   :  { %v376_v37 = vld [vmem:[%s2698_s1 + $0xae0] sm:$0xff]  ;;  %599 = vmatpush.msra.mxu2 %v133_v35  ;;  %522 = vmatpush.msrb.mxu0 %v312_v36 }
  0x56   :  { %v308_v40 = vld [vmem:[%s2698_s1 + $0x8c0] sm:$0xff]  ;;  %542 = vmatpush.msrb.mxu1 %v376_v37  ;;  %584 = vmatpush.msrb.mxu3 %v49_v46 }
  0x57   :  { %v372_v41 = vld [vmem:[%s2698_s1 + $0xac0] sm:$0xff]  ;;  %600 = vmatpush.msra.mxu2 %v129_v39  ;;  %523 = vmatpush.msrb.mxu0 %v308_v40 }
  0x58   :  { %v304_v44 = vld [vmem:[%s2698_s1 + $0x8a0] sm:$0xff]  ;;  %543 = vmatpush.msrb.mxu1 %v372_v41  ;;  %585 = vmatpush.msrb.mxu3 %v45_v50 }
  0x59   :  { %v368_v45 = vld [vmem:[%s2698_s1 + $0xaa0] sm:$0xff]  ;;  %601 = vmatpush.msra.mxu2 %v125_v43  ;;  %524 = vmatpush.msrb.mxu0 %v304_v44 }
  0x5a   :  { %v300_v48 = vld [vmem:[%s2698_s1 + $0x880] sm:$0xff]  ;;  %544 = vmatpush.msrb.mxu1 %v368_v45  ;;  %586 = vmatpush.msrb.mxu3 %v41_v54 }
  0x5b   :  { %v364_v49 = vld [vmem:[%s2698_s1 + $0xa80] sm:$0xff]  ;;  %602 = vmatpush.msra.mxu2 %v121_v47  ;;  %525 = vmatpush.msrb.mxu0 %v300_v48 }
  0x5c   :  { %v296_v52 = vld [vmem:[%s2698_s1 + $0x860] sm:$0xff]  ;;  %545 = vmatpush.msrb.mxu1 %v364_v49  ;;  %587 = vmatpush.msrb.mxu3 %v37_v58 }
  0x5d   :  { %v360_v53 = vld [vmem:[%s2698_s1 + $0xa60] sm:$0xff]  ;;  %603 = vmatpush.msra.mxu2 %v117_v51  ;;  %526 = vmatpush.msrb.mxu0 %v296_v52 }
  0x5e   :  { %v292_v56 = vld [vmem:[%s2698_s1 + $0x840] sm:$0xff]  ;;  %546 = vmatpush.msrb.mxu1 %v360_v53  ;;  %588 = vmatpush.msrb.mxu3 %v33_v62 }
  0x5f   :  { %v356_v57 = vld [vmem:[%s2698_s1 + $0xa40] sm:$0xff]  ;;  %604 = vmatpush.msra.mxu2 %v113_v55  ;;  %527 = vmatpush.msrb.mxu0 %v292_v56 }
  0x60   :  { %v288_v60 = vld [vmem:[%s2698_s1 + $0x820] sm:$0xff]  ;;  %547 = vmatpush.msrb.mxu1 %v356_v57  ;;  %1163 = vmatmul.msk.f32.vlgmr.msrb.gmra.mxu2 %vm430_vm0, %v1629_v63 }
  0x61   :  { %v352_v61 = vld [vmem:[%s2698_s1 + $0xa20] sm:$0xff]  ;;  %605 = vmatpush.msra.mxu2 %v109_v59  ;;  %528 = vmatpush.msrb.mxu0 %v288_v60 }
  0x62   :  { %v284_v1 = vld [vmem:[%s2698_s1 + $0x800] sm:$0xff]  ;;  %548 = vmatpush.msrb.mxu1 %v352_v61 }
  0x63   :  { %v348_v2 = vld [vmem:[%s2698_s1 + $0xa00] sm:$0xff] }
  0x64   :  { %v1648_v4 = vld [vmem:[%s2697_s0 + $0x20] sm:$0xff] }
  0x65   :  { %10 = vsyncpa [#allocation3], 0  ;;  %606 = vmatpush.msra.mxu2 %v105_v0  ;;  %529 = vmatpush.msrb.mxu0 %v284_v1  ;;  %v281_v6 = vld [vmem:[%s2698_s1 + $0x7e8] sm:$0xff]  ;;  %s1202_s21 = smov [#allocation2]   ;;  %s1154_s25 = sshll.u32 %s2702_s5, 4  ;;  %s1155_s25 = int_to_ptr.hbm [resolvable:$true] %s1154_s25 }
  0x66   :  { %v345_v7 = vld [vmem:[%s2698_s1 + $0x9e8] sm:$0xff]  ;;  %549 = vmatpush.msrb.mxu1 %v348_v2  ;;  %589 = vmatpush.msrb.mxu3 %v29_v3  ;;  %s1152_s22 = sshll.u32 %s1202_s21, 4  ;;  %s1153_s22 = int_to_ptr.vmem [resolvable:$true] %s1152_s22 }
  0x67   :  { %v1662_v8 = vld [vmem:[%s2697_s0 + $0x28] sm:$0xff]  ;;  %530 = vmatmul.f32.vlgmr.msrb.gmra.mxu0 %v1648_v4  ;;  %607 = vmatpush.msra.mxu2 %v101_v5 }
  0x68   :  { %v97_v9 = vld [vmem:[%s2698_s1 + $0x228] sm:$0xff]  ;;  %634 = vmatpush.msra.mxu1 %v281_v6  ;;  %654 = vmatpush.msra.mxu3 %v345_v7 }
  0x69   :  { %v277_v10 = vld [vmem:[%s2698_s1 + $0x7c8] sm:$0xff]  ;;  %550 = vmatmul.f32.vlgmr.msrb.gmra.mxu1 %v1662_v8  ;;  %608 = vmatpush.msra.mxu2 %v97_v9 }
  0x6a   :  { %v341_v12 = vld [vmem:[%s2698_s1 + $0x9c8] sm:$0xff]  ;;  %635 = vmatpush.msra.mxu1 %v277_v10  ;;  %590 = vmatmul.f32.vlgmr.msrb.gmra.mxu3 %v1479_v16 }
  0x6b   :  { %v93_v13 = vld [vmem:[%s2698_s1 + $0x208] sm:$0xff]  ;;  %655 = vmatpush.msra.mxu3 %v341_v12 }
  0x6c   :  { %v217_v14 = vld [vmem:[%s2698_s1 + $0x5e8] sm:$0xff]  ;;  %609 = vmatpush.msra.mxu2 %v93_v13 }
  0x6d   :  { %v273_v15 = vld [vmem:[%s2698_s1 + $0x7a8] sm:$0xff]  ;;  %614 = vmatpush.msra.mxu0 %v217_v14  ;;  %610 = vmatmul.f32.vlgmr.msra.gmra.mxu2 %v1503_v22  ;;  %v90_v14 = vld [vmem:[%s2698_s1 + $0x1f0] sm:$0xff] }
  0x6e   :  { %v337_v18 = vld [vmem:[%s2698_s1 + $0x9a8] sm:$0xff]  ;;  %636 = vmatpush.msra.mxu1 %v273_v15 }
  0x6f   :  { %v409_v19 = vld [vmem:[%s2698_s1 + $0xbe8] sm:$0xff]  ;;  %656 = vmatpush.msra.mxu3 %v337_v18 }
  0x70   :  { %v213_v20 = vld [vmem:[%s2698_s1 + $0x5c8] sm:$0xff]  ;;  %674 = vmatpush.msrb.mxu2 %v409_v19 }
  0x71   :  { %v269_v21 = vld [vmem:[%s2698_s1 + $0x788] sm:$0xff]  ;;  %615 = vmatpush.msra.mxu0 %v213_v20  ;;  %v86_v20 = vld [vmem:[%s2698_s1 + $0x1d0] sm:$0xff] }
  0x72   :  { %v333_v23 = vld [vmem:[%s2698_s1 + $0x988] sm:$0xff]  ;;  %637 = vmatpush.msra.mxu1 %v269_v21  ;;  %v154_v21 = vld [vmem:[%s2698_s1 + $0x3f0] sm:$0xff] }
  0x73   :  { %v405_v24 = vld [vmem:[%s2698_s1 + $0xbc8] sm:$0xff]  ;;  %657 = vmatpush.msra.mxu3 %v333_v23 }
  0x74   :  { %v209_v25 = vld [vmem:[%s2698_s1 + $0x5a8] sm:$0xff]  ;;  %675 = vmatpush.msrb.mxu2 %v405_v24 }
  0x75   :  { %v265_v26 = vld [vmem:[%s2698_s1 + $0x768] sm:$0xff]  ;;  %616 = vmatpush.msra.mxu0 %v209_v25  ;;  %v82_v25 = vld [vmem:[%s2698_s1 + $0x1b0] sm:$0xff] }
  0x76   :  { %v329_v27 = vld [vmem:[%s2698_s1 + $0x968] sm:$0xff]  ;;  %638 = vmatpush.msra.mxu1 %v265_v26  ;;  %v150_v26 = vld [vmem:[%s2698_s1 + $0x3d0] sm:$0xff] }
  0x77   :  { %v401_v28 = vld [vmem:[%s2698_s1 + $0xba8] sm:$0xff]  ;;  %658 = vmatpush.msra.mxu3 %v329_v27  ;;  %v282_v27 = vld [vmem:[%s2698_s1 + $0x7f0] sm:$0xff] }
  0x78   :  { %v205_v29 = vld [vmem:[%s2698_s1 + $0x588] sm:$0xff]  ;;  %676 = vmatpush.msrb.mxu2 %v401_v28  ;;  %v78_v28 = vld [vmem:[%s2698_s1 + $0x190] sm:$0xff] }
  0x79   :  { %v261_v30 = vld [vmem:[%s2698_s1 + $0x748] sm:$0xff]  ;;  %617 = vmatpush.msra.mxu0 %v205_v29  ;;  %v146_v29 = vld [vmem:[%s2698_s1 + $0x3b0] sm:$0xff] }
  0x7a   :  { %v325_v31 = vld [vmem:[%s2698_s1 + $0x948] sm:$0xff]  ;;  %639 = vmatpush.msra.mxu1 %v261_v30  ;;  %v278_v30 = vld [vmem:[%s2698_s1 + $0x7d0] sm:$0xff] }
  0x7b   :  { %v397_v32 = vld [vmem:[%s2698_s1 + $0xb88] sm:$0xff]  ;;  %659 = vmatpush.msra.mxu3 %v325_v31  ;;  %v74_v31 = vld [vmem:[%s2698_s1 + $0x170] sm:$0xff] }
  0x7c   :  { %v201_v33 = vld [vmem:[%s2698_s1 + $0x568] sm:$0xff]  ;;  %677 = vmatpush.msrb.mxu2 %v397_v32  ;;  %v142_v32 = vld [vmem:[%s2698_s1 + $0x390] sm:$0xff] }
  0x7d   :  { %v257_v34 = vld [vmem:[%s2698_s1 + $0x728] sm:$0xff]  ;;  %618 = vmatpush.msra.mxu0 %v201_v33  ;;  %v218_v33 = vld [vmem:[%s2698_s1 + $0x5f0] sm:$0xff] }
  0x7e   :  { %v321_v35 = vld [vmem:[%s2698_s1 + $0x928] sm:$0xff]  ;;  %640 = vmatpush.msra.mxu1 %v257_v34  ;;  %v274_v34 = vld [vmem:[%s2698_s1 + $0x7b0] sm:$0xff] }
  0x7f   :  { %v393_v36 = vld [vmem:[%s2698_s1 + $0xb68] sm:$0xff]  ;;  %660 = vmatpush.msra.mxu3 %v321_v35  ;;  %v70_v35 = vld [vmem:[%s2698_s1 + $0x150] sm:$0xff] }
  0x80   :  { %v197_v37 = vld [vmem:[%s2698_s1 + $0x548] sm:$0xff]  ;;  %678 = vmatpush.msrb.mxu2 %v393_v36  ;;  %v138_v36 = vld [vmem:[%s2698_s1 + $0x370] sm:$0xff] }
  0x81   :  { %v253_v38 = vld [vmem:[%s2698_s1 + $0x708] sm:$0xff]  ;;  %619 = vmatpush.msra.mxu0 %v197_v37  ;;  %v214_v37 = vld [vmem:[%s2698_s1 + $0x5d0] sm:$0xff] }
  0x82   :  { %v317_v39 = vld [vmem:[%s2698_s1 + $0x908] sm:$0xff]  ;;  %641 = vmatpush.msra.mxu1 %v253_v38  ;;  %v270_v38 = vld [vmem:[%s2698_s1 + $0x790] sm:$0xff] }
  0x83   :  { %v389_v40 = vld [vmem:[%s2698_s1 + $0xb48] sm:$0xff]  ;;  %661 = vmatpush.msra.mxu3 %v317_v39  ;;  %v66_v39 = vld [vmem:[%s2698_s1 + $0x130] sm:$0xff] }
  0x84   :  { %v193_v41 = vld [vmem:[%s2698_s1 + $0x528] sm:$0xff]  ;;  %679 = vmatpush.msrb.mxu2 %v389_v40  ;;  %v134_v40 = vld [vmem:[%s2698_s1 + $0x350] sm:$0xff] }
  0x85   :  { %v249_v42 = vld [vmem:[%s2698_s1 + $0x6e8] sm:$0xff]  ;;  %620 = vmatpush.msra.mxu0 %v193_v41  ;;  %v210_v41 = vld [vmem:[%s2698_s1 + $0x5b0] sm:$0xff] }
  0x86   :  { %v313_v43 = vld [vmem:[%s2698_s1 + $0x8e8] sm:$0xff]  ;;  %642 = vmatpush.msra.mxu1 %v249_v42  ;;  %v266_v42 = vld [vmem:[%s2698_s1 + $0x770] sm:$0xff] }
  0x87   :  { %v385_v44 = vld [vmem:[%s2698_s1 + $0xb28] sm:$0xff]  ;;  %662 = vmatpush.msra.mxu3 %v313_v43  ;;  %v62_v43 = vld [vmem:[%s2698_s1 + $0x110] sm:$0xff] }
  0x88   :  { %v189_v45 = vld [vmem:[%s2698_s1 + $0x508] sm:$0xff]  ;;  %680 = vmatpush.msrb.mxu2 %v385_v44  ;;  %v130_v44 = vld [vmem:[%s2698_s1 + $0x330] sm:$0xff] }
  0x89   :  { %v245_v46 = vld [vmem:[%s2698_s1 + $0x6c8] sm:$0xff]  ;;  %621 = vmatpush.msra.mxu0 %v189_v45  ;;  %v206_v45 = vld [vmem:[%s2698_s1 + $0x590] sm:$0xff] }
  0x8a   :  { %v309_v47 = vld [vmem:[%s2698_s1 + $0x8c8] sm:$0xff]  ;;  %643 = vmatpush.msra.mxu1 %v245_v46  ;;  %v262_v46 = vld [vmem:[%s2698_s1 + $0x750] sm:$0xff] }
  0x8b   :  { %v381_v48 = vld [vmem:[%s2698_s1 + $0xb08] sm:$0xff]  ;;  %663 = vmatpush.msra.mxu3 %v309_v47  ;;  %v58_v47 = vld [vmem:[%s2698_s1 + $0xf0] sm:$0xff] }
  0x8c   :  { %v185_v49 = vld [vmem:[%s2698_s1 + $0x4e8] sm:$0xff]  ;;  %681 = vmatpush.msrb.mxu2 %v381_v48  ;;  %v126_v48 = vld [vmem:[%s2698_s1 + $0x310] sm:$0xff] }
  0x8d   :  { %v241_v50 = vld [vmem:[%s2698_s1 + $0x6a8] sm:$0xff]  ;;  %622 = vmatpush.msra.mxu0 %v185_v49  ;;  %v202_v49 = vld [vmem:[%s2698_s1 + $0x570] sm:$0xff] }
  0x8e   :  { %v305_v51 = vld [vmem:[%s2698_s1 + $0x8a8] sm:$0xff]  ;;  %644 = vmatpush.msra.mxu1 %v241_v50  ;;  %v258_v50 = vld [vmem:[%s2698_s1 + $0x730] sm:$0xff] }
  0x8f   :  { %v377_v52 = vld [vmem:[%s2698_s1 + $0xae8] sm:$0xff]  ;;  %664 = vmatpush.msra.mxu3 %v305_v51  ;;  %v54_v51 = vld [vmem:[%s2698_s1 + $0xd0] sm:$0xff] }
  0x90   :  { %v237_v53 = vld [vmem:[%s2698_s1 + $0x688] sm:$0xff]  ;;  %682 = vmatpush.msrb.mxu2 %v377_v52  ;;  %v122_v52 = vld [vmem:[%s2698_s1 + $0x2f0] sm:$0xff] }
  0x91   :  { %v301_v54 = vld [vmem:[%s2698_s1 + $0x888] sm:$0xff]  ;;  %645 = vmatpush.msra.mxu1 %v237_v53  ;;  %v198_v53 = vld [vmem:[%s2698_s1 + $0x550] sm:$0xff] }
  0x92   :  { %v181_v55 = vld [vmem:[%s2698_s1 + $0x4c8] sm:$0xff]  ;;  %665 = vmatpush.msra.mxu3 %v301_v54  ;;  %v254_v54 = vld [vmem:[%s2698_s1 + $0x710] sm:$0xff] }
  0x93   :  { %v373_v56 = vld [vmem:[%s2698_s1 + $0xac8] sm:$0xff]  ;;  %623 = vmatpush.msra.mxu0 %v181_v55  ;;  %v50_v55 = vld [vmem:[%s2698_s1 + $0xb0] sm:$0xff] }
  0x94   :  { %v233_v57 = vld [vmem:[%s2698_s1 + $0x668] sm:$0xff]  ;;  %683 = vmatpush.msrb.mxu2 %v373_v56  ;;  %v118_v56 = vld [vmem:[%s2698_s1 + $0x2d0] sm:$0xff] }
  0x95   :  { %v297_v58 = vld [vmem:[%s2698_s1 + $0x868] sm:$0xff]  ;;  %646 = vmatpush.msra.mxu1 %v233_v57  ;;  %v194_v57 = vld [vmem:[%s2698_s1 + $0x530] sm:$0xff] }
  0x96   :  { %v177_v59 = vld [vmem:[%s2698_s1 + $0x4a8] sm:$0xff]  ;;  %666 = vmatpush.msra.mxu3 %v297_v58  ;;  %v250_v58 = vld [vmem:[%s2698_s1 + $0x6f0] sm:$0xff] }
  0x97   :  { %v369_v60 = vld [vmem:[%s2698_s1 + $0xaa8] sm:$0xff]  ;;  %624 = vmatpush.msra.mxu0 %v177_v59  ;;  %v46_v59 = vld [vmem:[%s2698_s1 + $0x90] sm:$0xff] }
  0x98   :  { %v229_v61 = vld [vmem:[%s2698_s1 + $0x648] sm:$0xff]  ;;  %684 = vmatpush.msrb.mxu2 %v369_v60  ;;  %v114_v60 = vld [vmem:[%s2698_s1 + $0x2b0] sm:$0xff] }
  0x99   :  { %v293_v62 = vld [vmem:[%s2698_s1 + $0x848] sm:$0xff]  ;;  %647 = vmatpush.msra.mxu1 %v229_v61  ;;  %v190_v61 = vld [vmem:[%s2698_s1 + $0x510] sm:$0xff] }
  0x9a   :  { %v173_v0 = vld [vmem:[%s2698_s1 + $0x488] sm:$0xff]  ;;  %667 = vmatpush.msra.mxu3 %v293_v62  ;;  %v246_v62 = vld [vmem:[%s2698_s1 + $0x6d0] sm:$0xff] }
  0x9b   :  { %v365_v1 = vld [vmem:[%s2698_s1 + $0xa88] sm:$0xff]  ;;  %625 = vmatpush.msra.mxu0 %v173_v0  ;;  %v42_v0 = vld [vmem:[%s2698_s1 + $0x70] sm:$0xff] }
  0x9c   :  { %v225_v2 = vld [vmem:[%s2698_s1 + $0x628] sm:$0xff]  ;;  %685 = vmatpush.msrb.mxu2 %v365_v1  ;;  %v110_v1 = vld [vmem:[%s2698_s1 + $0x290] sm:$0xff] }
  0x9d   :  { %v289_v3 = vld [vmem:[%s2698_s1 + $0x828] sm:$0xff]  ;;  %648 = vmatpush.msra.mxu1 %v225_v2  ;;  %v186_v2 = vld [vmem:[%s2698_s1 + $0x4f0] sm:$0xff] }
  0x9e   :  { %v169_v5 = vld [vmem:[%s2698_s1 + $0x468] sm:$0xff]  ;;  %668 = vmatpush.msra.mxu3 %v289_v3  ;;  %v242_v3 = vld [vmem:[%s2698_s1 + $0x6b0] sm:$0xff] }
  0x9f   :  { %v361_v6 = vld [vmem:[%s2698_s1 + $0xa68] sm:$0xff]  ;;  %626 = vmatpush.msra.mxu0 %v169_v5  ;;  %v38_v5 = vld [vmem:[%s2698_s1 + $0x50] sm:$0xff] }
  0xa0   :  { %v221_v7 = vld [vmem:[%s2698_s1 + $0x608] sm:$0xff]  ;;  %686 = vmatpush.msrb.mxu2 %v361_v6  ;;  %v106_v6 = vld [vmem:[%s2698_s1 + $0x270] sm:$0xff] }
  0xa1   :  { %v285_v9 = vld [vmem:[%s2698_s1 + $0x808] sm:$0xff]  ;;  %649 = vmatpush.msra.mxu1 %v221_v7  ;;  %v182_v7 = vld [vmem:[%s2698_s1 + $0x4d0] sm:$0xff] }
  0xa2   :  { %v165_v10 = vld [vmem:[%s2698_s1 + $0x448] sm:$0xff]  ;;  %669 = vmatpush.msra.mxu3 %v285_v9  ;;  %650 = vmatmul.f32.vlgmr.msra.gmra.mxu1 %v1484_v17  ;;  %v238_v9 = vld [vmem:[%s2698_s1 + $0x690] sm:$0xff] }
  0xa3   :  { %v357_v12 = vld [vmem:[%s2698_s1 + $0xa48] sm:$0xff]  ;;  %627 = vmatpush.msra.mxu0 %v165_v10  ;;  %670 = vmatmul.f32.vlgmr.msra.gmra.mxu3 %v1648_v4  ;;  %v34_v10 = vld [vmem:[%s2698_s1 + $0x30] sm:$0xff] }
  0xa4   :  { %v417_v13 = vld [vmem:[%s2698_s1 + $0xc28] sm:$0xff]  ;;  %687 = vmatpush.msrb.mxu2 %v357_v12  ;;  %714 = vmatpush.msrb.mxu1 %v90_v14  ;;  %v102_v12 = vld [vmem:[%s2698_s1 + $0x250] sm:$0xff] }
  0xa5   :  { %v161_v15 = vld [vmem:[%s2698_s1 + $0x428] sm:$0xff]  ;;  %708 = vmatpush.msrb.mxu3 %v417_v13  ;;  %v178_v13 = vld [vmem:[%s2698_s1 + $0x4b0] sm:$0xff] }
  0xa6   :  { %v353_v18 = vld [vmem:[%s2698_s1 + $0xa28] sm:$0xff]  ;;  %628 = vmatpush.msra.mxu0 %v161_v15  ;;  %715 = vmatpush.msrb.mxu1 %v86_v20  ;;  %v234_v14 = vld [vmem:[%s2698_s1 + $0x670] sm:$0xff] }
  0xa7   :  { %v413_v19 = vld [vmem:[%s2698_s1 + $0xc08] sm:$0xff]  ;;  %688 = vmatpush.msrb.mxu2 %v353_v18  ;;  %v30_v15 = vld [vmem:[%s2698_s1 + $0x10] sm:$0xff] }
  0xa8   :  { %v157_v23 = vld [vmem:[%s2698_s1 + $0x408] sm:$0xff]  ;;  %709 = vmatpush.msrb.mxu3 %v413_v19  ;;  %716 = vmatpush.msrb.mxu1 %v82_v25  ;;  %v98_v18 = vld [vmem:[%s2698_s1 + $0x230] sm:$0xff] }
  0xa9   :  { %v349_v24 = vld [vmem:[%s2698_s1 + $0xa08] sm:$0xff]  ;;  %629 = vmatpush.msra.mxu0 %v157_v23  ;;  %v346_v19 = vld [vmem:[%s2698_s1 + $0x9f0] sm:$0xff] }
  0xaa   :  { %734 = vmatpush.msra.mxu3 %v154_v21  ;;  %689 = vmatpush.msrb.mxu2 %v349_v24  ;;  %v230_v20 = vld [vmem:[%s2698_s1 + $0x650] sm:$0xff] }
  0xab   :  { %630 = vmatmul.f32.vlgmr.msra.gmra.mxu0 %v1461_v11  ;;  %690 = vmatmul.f32.vlgmr.msrb.gmra.mxu2 %v1662_v8  ;;  %v174_v21 = vld [vmem:[%s2698_s1 + $0x490] sm:$0xff] }
  0xac   :  { %735 = vmatpush.msra.mxu3 %v150_v26  ;;  %774 = vmatpush.msra.mxu2 %v282_v27  ;;  %v94_v23 = vld [vmem:[%s2698_s1 + $0x210] sm:$0xff] }
  0xad   :  { %717 = vmatpush.msrb.mxu1 %v78_v28  ;;  %1164 = vmatmul.msk.f32.vlgmr.msrb.gmra.mxu3 %vm430_vm0, %v1629_v63  ;;  %v342_v24 = vld [vmem:[%s2698_s1 + $0x9d0] sm:$0xff] }
  0xae   :  { %736 = vmatpush.msra.mxu3 %v146_v29  ;;  %775 = vmatpush.msra.mxu2 %v278_v30  ;;  %v226_v25 = vld [vmem:[%s2698_s1 + $0x630] sm:$0xff] }
  0xaf   :  { %718 = vmatpush.msrb.mxu1 %v74_v31  ;;  %754 = vmatpush.msrb.mxu0 %v218_v33  ;;  %v170_v26 = vld [vmem:[%s2698_s1 + $0x470] sm:$0xff] }
  0xb0   :  { %737 = vmatpush.msra.mxu3 %v142_v32  ;;  %776 = vmatpush.msra.mxu2 %v274_v34  ;;  %v410_v27 = vld [vmem:[%s2698_s1 + $0xbf0] sm:$0xff]  ;;  %v91_v32 = vld [vmem:[%s2698_s1 + $0x1f8] sm:$0xff] }
  0xb1   :  { %719 = vmatpush.msrb.mxu1 %v70_v35  ;;  %755 = vmatpush.msrb.mxu0 %v214_v37  ;;  %v338_v28 = vld [vmem:[%s2698_s1 + $0x9b0] sm:$0xff] }
  0xb2   :  { %738 = vmatpush.msra.mxu3 %v138_v36  ;;  %777 = vmatpush.msra.mxu2 %v270_v38  ;;  %v222_v29 = vld [vmem:[%s2698_s1 + $0x610] sm:$0xff]  ;;  %v87_v36 = vld [vmem:[%s2698_s1 + $0x1d8] sm:$0xff] }
  0xb3   :  { %720 = vmatpush.msrb.mxu1 %v66_v39  ;;  %756 = vmatpush.msrb.mxu0 %v210_v41  ;;  %v166_v30 = vld [vmem:[%s2698_s1 + $0x450] sm:$0xff]  ;;  %v83_v39 = vld [vmem:[%s2698_s1 + $0x1b8] sm:$0xff] }
  0xb4   :  { %739 = vmatpush.msra.mxu3 %v134_v40  ;;  %778 = vmatpush.msra.mxu2 %v266_v42  ;;  %v406_v31 = vld [vmem:[%s2698_s1 + $0xbd0] sm:$0xff] }
  0xb5   :  { %721 = vmatpush.msrb.mxu1 %v62_v43  ;;  %757 = vmatpush.msrb.mxu0 %v206_v45  ;;  %v334_v33 = vld [vmem:[%s2698_s1 + $0x990] sm:$0xff]  ;;  %v79_v43 = vld [vmem:[%s2698_s1 + $0x198] sm:$0xff] }
  0xb6   :  { %740 = vmatpush.msra.mxu3 %v130_v44  ;;  %779 = vmatpush.msra.mxu2 %v262_v46  ;;  %v162_v34 = vld [vmem:[%s2698_s1 + $0x430] sm:$0xff]  ;;  %v155_v46 = vld [vmem:[%s2698_s1 + $0x3f8] sm:$0xff] }
  0xb7   :  { %722 = vmatpush.msrb.mxu1 %v58_v47  ;;  %758 = vmatpush.msrb.mxu0 %v202_v49  ;;  %v402_v35 = vld [vmem:[%s2698_s1 + $0xbb0] sm:$0xff]  ;;  %v71_v49 = vld [vmem:[%s2698_s1 + $0x158] sm:$0xff] }
  0xb8   :  { %741 = vmatpush.msra.mxu3 %v126_v48  ;;  %780 = vmatpush.msra.mxu2 %v258_v50  ;;  %v330_v37 = vld [vmem:[%s2698_s1 + $0x970] sm:$0xff]  ;;  %v151_v50 = vld [vmem:[%s2698_s1 + $0x3d8] sm:$0xff] }
  0xb9   :  { %723 = vmatpush.msrb.mxu1 %v54_v51  ;;  %759 = vmatpush.msrb.mxu0 %v198_v53  ;;  %v398_v38 = vld [vmem:[%s2698_s1 + $0xb90] sm:$0xff]  ;;  %v67_v53 = vld [vmem:[%s2698_s1 + $0x138] sm:$0xff] }
  0xba   :  { %742 = vmatpush.msra.mxu3 %v122_v52  ;;  %781 = vmatpush.msra.mxu2 %v254_v54  ;;  %v326_v40 = vld [vmem:[%s2698_s1 + $0x950] sm:$0xff] }
  0xbb   :  { %724 = vmatpush.msrb.mxu1 %v50_v55  ;;  %760 = vmatpush.msrb.mxu0 %v194_v57  ;;  %v418_v41 = vld [vmem:[%s2698_s1 + $0xc30] sm:$0xff]  ;;  %v143_v57 = vld [vmem:[%s2698_s1 + $0x398] sm:$0xff] }
  0xbc   :  { %743 = vmatpush.msra.mxu3 %v118_v56  ;;  %782 = vmatpush.msra.mxu2 %v250_v58  ;;  %v394_v42 = vld [vmem:[%s2698_s1 + $0xb70] sm:$0xff]  ;;  %v63_v56 = vld [vmem:[%s2698_s1 + $0x118] sm:$0xff] }
  0xbd   :  { %725 = vmatpush.msrb.mxu1 %v46_v59  ;;  %761 = vmatpush.msrb.mxu0 %v190_v61  ;;  %v414_v44 = vld [vmem:[%s2698_s1 + $0xc10] sm:$0xff]  ;;  %v139_v61 = vld [vmem:[%s2698_s1 + $0x378] sm:$0xff] }
  0xbe   :  { %744 = vmatpush.msra.mxu3 %v114_v60  ;;  %783 = vmatpush.msra.mxu2 %v246_v62  ;;  %v390_v45 = vld [vmem:[%s2698_s1 + $0xb50] sm:$0xff]  ;;  %v59_v60 = vld [vmem:[%s2698_s1 + $0xf8] sm:$0xff] }
  0xbf   :  { %726 = vmatpush.msrb.mxu1 %v42_v0  ;;  %762 = vmatpush.msrb.mxu0 %v186_v2  ;;  %v318_v47 = vld [vmem:[%s2698_s1 + $0x910] sm:$0xff]  ;;  %v135_v2 = vld [vmem:[%s2698_s1 + $0x358] sm:$0xff] }
  0xc0   :  { %745 = vmatpush.msra.mxu3 %v110_v1  ;;  %784 = vmatpush.msra.mxu2 %v242_v3  ;;  %v386_v48 = vld [vmem:[%s2698_s1 + $0xb30] sm:$0xff]  ;;  %v55_v1 = vld [vmem:[%s2698_s1 + $0xd8] sm:$0xff] }
  0xc1   :  { %727 = vmatpush.msrb.mxu1 %v38_v5  ;;  %763 = vmatpush.msrb.mxu0 %v182_v7  ;;  %v314_v51 = vld [vmem:[%s2698_s1 + $0x8f0] sm:$0xff]  ;;  %v131_v7 = vld [vmem:[%s2698_s1 + $0x338] sm:$0xff] }
  0xc2   :  { %746 = vmatpush.msra.mxu3 %v106_v6  ;;  %785 = vmatpush.msra.mxu2 %v238_v9  ;;  %v382_v52 = vld [vmem:[%s2698_s1 + $0xb10] sm:$0xff]  ;;  %v51_v6 = vld [vmem:[%s2698_s1 + $0xb8] sm:$0xff] }
  0xc3   :  { %728 = vmatpush.msrb.mxu1 %v34_v10  ;;  %764 = vmatpush.msrb.mxu0 %v178_v13  ;;  %v310_v54 = vld [vmem:[%s2698_s1 + $0x8d0] sm:$0xff]  ;;  %v127_v13 = vld [vmem:[%s2698_s1 + $0x318] sm:$0xff] }
  0xc4   :  { %747 = vmatpush.msra.mxu3 %v102_v12  ;;  %786 = vmatpush.msra.mxu2 %v234_v14  ;;  %v378_v55 = vld [vmem:[%s2698_s1 + $0xaf0] sm:$0xff]  ;;  %v47_v12 = vld [vmem:[%s2698_s1 + $0x98] sm:$0xff] }
  0xc5   :  { %729 = vmatpush.msrb.mxu1 %v30_v15  ;;  %765 = vmatpush.msrb.mxu0 %v174_v21  ;;  %v306_v58 = vld [vmem:[%s2698_s1 + $0x8b0] sm:$0xff] }
  0xc6   :  { %748 = vmatpush.msra.mxu3 %v98_v18  ;;  %787 = vmatpush.msra.mxu2 %v230_v20  ;;  %v374_v59 = vld [vmem:[%s2698_s1 + $0xad0] sm:$0xff]  ;;  %v43_v18 = vld [vmem:[%s2698_s1 + $0x78] sm:$0xff] }
  0xc7   :  { %794 = vmatpush.msra.mxu1 %v346_v19  ;;  %766 = vmatpush.msrb.mxu0 %v170_v26  ;;  %v302_v62 = vld [vmem:[%s2698_s1 + $0x890] sm:$0xff]  ;;  %v123_v19 = vld [vmem:[%s2698_s1 + $0x2f8] sm:$0xff] }
  0xc8   :  { %749 = vmatpush.msra.mxu3 %v94_v23  ;;  %788 = vmatpush.msra.mxu2 %v226_v25  ;;  %v370_v0 = vld [vmem:[%s2698_s1 + $0xab0] sm:$0xff]  ;;  %v39_v23 = vld [vmem:[%s2698_s1 + $0x58] sm:$0xff] }
  0xc9   :  { %795 = vmatpush.msra.mxu1 %v342_v24  ;;  %750 = vmatmul.f32.vlgmr.msra.gmra.mxu3 %v1503_v22  ;;  %v158_v22 = vld [vmem:[%s2698_s1 + $0x410] sm:$0xff]  ;;  %v119_v24 = vld [vmem:[%s2698_s1 + $0x2d8] sm:$0xff] }
  0xca   :  { %814 = vmatpush.msrb.mxu3 %v410_v27  ;;  %789 = vmatpush.msra.mxu2 %v222_v29  ;;  %v298_v3 = vld [vmem:[%s2698_s1 + $0x870] sm:$0xff]  ;;  %v219_v26 = vld [vmem:[%s2698_s1 + $0x5f8] sm:$0xff] }
  0xcb   :  { %796 = vmatpush.msra.mxu1 %v338_v28  ;;  %767 = vmatpush.msrb.mxu0 %v166_v30  ;;  %v366_v5 = vld [vmem:[%s2698_s1 + $0xa90] sm:$0xff]  ;;  %v35_v27 = vld [vmem:[%s2698_s1 + $0x38] sm:$0xff] }
  0xcc   :  { %815 = vmatpush.msrb.mxu3 %v406_v31  ;;  %854 = vmatpush.msrb.mxu2 %v91_v32  ;;  %v294_v9 = vld [vmem:[%s2698_s1 + $0x850] sm:$0xff]  ;;  %v115_v28 = vld [vmem:[%s2698_s1 + $0x2b8] sm:$0xff] }
  0xcd   :  { %797 = vmatpush.msra.mxu1 %v334_v33  ;;  %768 = vmatpush.msrb.mxu0 %v162_v34  ;;  %v362_v10 = vld [vmem:[%s2698_s1 + $0xa70] sm:$0xff]  ;;  %v215_v29 = vld [vmem:[%s2698_s1 + $0x5d8] sm:$0xff] }
  0xce   :  { %816 = vmatpush.msrb.mxu3 %v402_v35  ;;  %855 = vmatpush.msrb.mxu2 %v87_v36  ;;  %v290_v14 = vld [vmem:[%s2698_s1 + $0x830] sm:$0xff]  ;;  %v31_v30 = vld [vmem:[%s2698_s1 + $0x18] sm:$0xff] }
  0xcf   :  { %798 = vmatpush.msra.mxu1 %v330_v37  ;;  %769 = vmatpush.msrb.mxu0 %v158_v22  ;;  %v358_v15 = vld [vmem:[%s2698_s1 + $0xa50] sm:$0xff]  ;;  %v111_v31 = vld [vmem:[%s2698_s1 + $0x298] sm:$0xff] }
  0xd0   :  { %730 = vmatmul.f32.vlgmr.msrb.gmra.mxu1 %v1479_v16  ;;  %790 = vmatmul.f32.vlgmr.msra.gmra.mxu2 %v1484_v17  ;;  %v322_v16 = vld [vmem:[%s2698_s1 + $0x930] sm:$0xff]  ;;  %v75_v17 = vld [vmem:[%s2698_s1 + $0x178] sm:$0xff] }
  0xd1   :  { %817 = vmatpush.msrb.mxu3 %v398_v38  ;;  %856 = vmatpush.msrb.mxu2 %v83_v39  ;;  %v286_v20 = vld [vmem:[%s2698_s1 + $0x810] sm:$0xff]  ;;  %v347_v32 = vld [vmem:[%s2698_s1 + $0x9f8] sm:$0xff] }
  0xd2   :  { %799 = vmatpush.msra.mxu1 %v326_v40  ;;  %848 = vmatpush.msra.mxu0 %v418_v41  ;;  %v354_v21 = vld [vmem:[%s2698_s1 + $0xa30] sm:$0xff]  ;;  %v279_v33 = vld [vmem:[%s2698_s1 + $0x7d8] sm:$0xff] }
  0xd3   :  { %818 = vmatpush.msrb.mxu3 %v394_v42  ;;  %857 = vmatpush.msrb.mxu2 %v79_v43  ;;  %v350_v25 = vld [vmem:[%s2698_s1 + $0xa10] sm:$0xff]  ;;  %v107_v34 = vld [vmem:[%s2698_s1 + $0x278] sm:$0xff] }
  0xd4   :  { %800 = vmatpush.msra.mxu1 %v322_v16  ;;  %849 = vmatpush.msra.mxu0 %v414_v44  ;;  %v343_v35 = vld [vmem:[%s2698_s1 + $0x9d8] sm:$0xff] }
  0xd5   :  { %819 = vmatpush.msrb.mxu3 %v390_v45  ;;  %770 = vmatmul.f32.vlgmr.msrb.gmra.mxu0 %v1461_v11  ;;  %v147_v11 = vld [vmem:[%s2698_s1 + $0x3b8] sm:$0xff] }
  0xd6   :  { %858 = vmatpush.msrb.mxu2 %v75_v17  ;;  %874 = vmatpush.msrb.mxu0 %v155_v46  ;;  %v211_v36 = vld [vmem:[%s2698_s1 + $0x5b8] sm:$0xff] }
  0xd7   :  { %801 = vmatpush.msra.mxu1 %v318_v47  ;;  %820 = vmatpush.msrb.mxu3 %v386_v48  ;;  %v103_v37 = vld [vmem:[%s2698_s1 + $0x258] sm:$0xff] }
  0xd8   :  { %859 = vmatpush.msrb.mxu2 %v71_v49  ;;  %875 = vmatpush.msrb.mxu0 %v151_v50  ;;  %v339_v22 = vld [vmem:[%s2698_s1 + $0x9b8] sm:$0xff] }
  0xd9   :  { %802 = vmatpush.msra.mxu1 %v314_v51  ;;  %821 = vmatpush.msrb.mxu3 %v382_v52  ;;  %v271_v38 = vld [vmem:[%s2698_s1 + $0x798] sm:$0xff] }
  0xda   :  { %860 = vmatpush.msrb.mxu2 %v67_v53  ;;  %876 = vmatpush.msrb.mxu0 %v147_v11  ;;  %v207_v39 = vld [vmem:[%s2698_s1 + $0x598] sm:$0xff] }
  0xdb   :  { %803 = vmatpush.msra.mxu1 %v310_v54  ;;  %822 = vmatpush.msrb.mxu3 %v378_v55  ;;  %v99_v40 = vld [vmem:[%s2698_s1 + $0x238] sm:$0xff] }
  0xdc   :  { %861 = vmatpush.msrb.mxu2 %v63_v56  ;;  %877 = vmatpush.msrb.mxu0 %v143_v57  ;;  %v267_v41 = vld [vmem:[%s2698_s1 + $0x778] sm:$0xff] }
  0xdd   :  { %804 = vmatpush.msra.mxu1 %v306_v58  ;;  %823 = vmatpush.msrb.mxu3 %v374_v59  ;;  %v203_v42 = vld [vmem:[%s2698_s1 + $0x578] sm:$0xff] }
  0xde   :  { %862 = vmatpush.msrb.mxu2 %v59_v60  ;;  %878 = vmatpush.msrb.mxu0 %v139_v61  ;;  %v95_v43 = vld [vmem:[%s2698_s1 + $0x218] sm:$0xff] }
  0xdf   :  { %805 = vmatpush.msra.mxu1 %v302_v62  ;;  %824 = vmatpush.msrb.mxu3 %v370_v0  ;;  %v331_v16 = vld [vmem:[%s2698_s1 + $0x978] sm:$0xff] }
  0xe0   :  { %863 = vmatpush.msrb.mxu2 %v55_v1  ;;  %879 = vmatpush.msrb.mxu0 %v135_v2  ;;  %v263_v44 = vld [vmem:[%s2698_s1 + $0x758] sm:$0xff] }
  0xe1   :  { %806 = vmatpush.msra.mxu1 %v298_v3  ;;  %825 = vmatpush.msrb.mxu3 %v366_v5  ;;  %v411_v45 = vld [vmem:[%s2698_s1 + $0xbf8] sm:$0xff] }
  0xe2   :  { %864 = vmatpush.msrb.mxu2 %v51_v6  ;;  %880 = vmatpush.msrb.mxu0 %v131_v7  ;;  %v327_v17 = vld [vmem:[%s2698_s1 + $0x958] sm:$0xff] }
  0xe3   :  { %807 = vmatpush.msra.mxu1 %v294_v9  ;;  %826 = vmatpush.msrb.mxu3 %v362_v10  ;;  %v199_v46 = vld [vmem:[%s2698_s1 + $0x558] sm:$0xff] }
  0xe4   :  { %865 = vmatpush.msrb.mxu2 %v47_v12  ;;  %881 = vmatpush.msrb.mxu0 %v127_v13  ;;  %v259_v47 = vld [vmem:[%s2698_s1 + $0x738] sm:$0xff] }
  0xe5   :  { %808 = vmatpush.msra.mxu1 %v290_v14  ;;  %827 = vmatpush.msrb.mxu3 %v358_v15  ;;  %v407_v48 = vld [vmem:[%s2698_s1 + $0xbd8] sm:$0xff] }
  0xe6   :  { %866 = vmatpush.msrb.mxu2 %v43_v18  ;;  %882 = vmatpush.msrb.mxu0 %v123_v19  ;;  %v323_v49 = vld [vmem:[%s2698_s1 + $0x938] sm:$0xff]  ;;  %v1169_v19 = vld [vmem:[%s2697_s0] sm:$0xff] }
  0xe7   :  { %809 = vmatpush.msra.mxu1 %v286_v20  ;;  %828 = vmatpush.msrb.mxu3 %v354_v21  ;;  %v195_v50 = vld [vmem:[%s2698_s1 + $0x538] sm:$0xff] }
  0xe8   :  { %810 = vmatmul.f32.vlgmr.msra.gmra.mxu1 %v1648_v4  ;;  %867 = vmatpush.msrb.mxu2 %v39_v23  ;;  %v283_v4 = vld [vmem:[%s2698_s1 + $0x7f8] sm:$0xff] }
  0xe9   :  { %883 = vmatpush.msrb.mxu0 %v119_v24  ;;  %829 = vmatpush.msrb.mxu3 %v350_v25  ;;  %v255_v51 = vld [vmem:[%s2698_s1 + $0x718] sm:$0xff] }
  0xea   :  { %894 = vmatpush.msrb.mxu1 %v219_v26  ;;  %868 = vmatpush.msrb.mxu2 %v35_v27  ;;  %v403_v52 = vld [vmem:[%s2698_s1 + $0xbb8] sm:$0xff]  ;;  %v2444_v27 = vld [vmem:[%s2699_s2] sm:$0xf] }
  0xeb   :  { %884 = vmatpush.msrb.mxu0 %v115_v28  ;;  %830 = vmatmul.f32.vlgmr.msrb.gmra.mxu3 %v1662_v8  ;;  %v275_v8 = vld [vmem:[%s2698_s1 + $0x7b8] sm:$0xff] }
  0xec   :  { %895 = vmatpush.msrb.mxu1 %v215_v29  ;;  %914 = vmatpush.msra.mxu3 %v283_v4  ;;  %v319_v53 = vld [vmem:[%s2698_s1 + $0x918] sm:$0xff] }
  0xed   :  { %869 = vmatpush.msrb.mxu2 %v31_v30  ;;  %885 = vmatpush.msrb.mxu0 %v111_v31  ;;  %v191_v11 = vld [vmem:[%s2698_s1 + $0x518] sm:$0xff]  ;;  %v422_v31 = vperm.slane %v2444_v27, 0 }
  0xee   :  { %915 = vmatpush.msra.mxu3 %v279_v33  ;;  %1165 = vmatmul.msk.f32.vlgmr.msra.gmra.mxu0 %vm430_vm0, %v1629_v63  ;;  %v335_v63 = vld [vmem:[%s2698_s1 + $0x998] sm:$0xff]  ;;  %v1012_v33 = vld [vmem:[%s2700_s3 + $0x70] sm:$0xff] }
  0xef   :  { %934 = vmatpush.msra.mxu2 %v347_v32  ;;  %886 = vmatpush.msrb.mxu0 %v107_v34  ;;  %v251_v54 = vld [vmem:[%s2698_s1 + $0x6f8] sm:$0xff]  ;;  %v451_v34 = vpop.f32.mrf.mxu0 }
  0xf0   :  { %916 = vmatpush.msra.mxu3 %v275_v8  ;;  %896 = vmatpush.msrb.mxu1 %v211_v36  ;;  %v399_v55 = vld [vmem:[%s2698_s1 + $0xb98] sm:$0xff]  ;;  %v1171_v36 = vld [vmem:[%s2697_s0 + $0x20] sm:$0xff] }
  0xf1   :  { %935 = vmatpush.msra.mxu2 %v343_v35  ;;  %887 = vmatpush.msrb.mxu0 %v103_v37  ;;  %v315_v56 = vld [vmem:[%s2698_s1 + $0x8f8] sm:$0xff]  ;;  %v1011_v37 = vld [vmem:[%s2700_s3 + $0x68] sm:$0xff] }
  0xf2   :  { %917 = vmatpush.msra.mxu3 %v271_v38  ;;  %897 = vmatpush.msrb.mxu1 %v207_v39  ;;  %v187_v57 = vld [vmem:[%s2698_s1 + $0x4f8] sm:$0xff] }
  0xf3   :  { %936 = vmatpush.msra.mxu2 %v339_v22  ;;  %888 = vmatpush.msrb.mxu0 %v99_v40  ;;  %v247_v58 = vld [vmem:[%s2698_s1 + $0x6d8] sm:$0xff]  ;;  %v1172_v22 = vld [vmem:[%s2697_s0 + $0x8] sm:$0xff]  ;;  %v452_v40 = vadd.f32 %v451_v34, %v422_v31 }
  0xf4   :  { %918 = vmatpush.msra.mxu3 %v267_v41  ;;  %898 = vmatpush.msrb.mxu1 %v203_v42  ;;  %v395_v59 = vld [vmem:[%s2698_s1 + $0xb78] sm:$0xff]  ;;  %v471_v41 = vpop.f32.mrf.mxu1  ;;  %v1173_v42 = vld [vmem:[%s2697_s0 + $0x10] sm:$0xff] }
  0xf5   :  { %937 = vmatpush.msra.mxu2 %v335_v63  ;;  %889 = vmatpush.msrb.mxu0 %v95_v43  ;;  %v311_v60 = vld [vmem:[%s2698_s1 + $0x8d8] sm:$0xff]  ;;  %v1010_v63 = vld [vmem:[%s2700_s3 + $0x60] sm:$0xff] }
  0xf6   :  { %919 = vmatpush.msra.mxu3 %v263_v44  ;;  %899 = vmatpush.msrb.mxu1 %v199_v46  ;;  %v183_v61 = vld [vmem:[%s2698_s1 + $0x4d8] sm:$0xff]  ;;  %v472_v46 = vadd.f32 %v471_v41, %v452_v40 }
  0xf7   :  { %938 = vmatpush.msra.mxu2 %v331_v16  ;;  %954 = vmatpush.msra.mxu0 %v411_v45  ;;  %v243_v62 = vld [vmem:[%s2698_s1 + $0x6b8] sm:$0xff] }
  0xf8   :  { %920 = vmatpush.msra.mxu3 %v259_v47  ;;  %900 = vmatpush.msrb.mxu1 %v195_v50  ;;  %v391_v0 = vld [vmem:[%s2698_s1 + $0xb58] sm:$0xff]  ;;  %v491_v47 = vpop.f32.mrf.mxu2  ;;  %v511_v50 = vpop.f32.mrf.mxu3 }
  0xf9   :  { %939 = vmatpush.msra.mxu2 %v327_v17  ;;  %955 = vmatpush.msra.mxu0 %v407_v48  ;;  %v307_v1 = vld [vmem:[%s2698_s1 + $0x8b8] sm:$0xff]  ;;  %v1008_v48 = vld [vmem:[%s2700_s3 + $0x50] sm:$0xff] }
  0xfa   :  { %921 = vmatpush.msra.mxu3 %v255_v51  ;;  %901 = vmatpush.msrb.mxu1 %v191_v11  ;;  %v179_v2 = vld [vmem:[%s2698_s1 + $0x4b8] sm:$0xff]  ;;  %v1007_v51 = vld [vmem:[%s2700_s3 + $0x48] sm:$0xff]  ;;  %v492_v11 = vadd.f32 %v491_v47, %v472_v46  ;;  %v1038_v46 = vld [vmem:[%s2700_s3 + $0x140] sm:$0xff] }
  0xfb   :  { %940 = vmatpush.msra.mxu2 %v323_v49  ;;  %956 = vmatpush.msra.mxu0 %v403_v52  ;;  %v239_v3 = vld [vmem:[%s2698_s1 + $0x698] sm:$0xff]  ;;  %v1028_v49 = vld [vmem:[%s2700_s3 + $0xf0] sm:$0xff]  ;;  %v1174_v52 = vld [vmem:[%s2697_s0 + $0x28] sm:$0xff] }
  0xfc   :  { %922 = vmatpush.msra.mxu3 %v251_v54  ;;  %902 = vmatpush.msrb.mxu1 %v187_v57  ;;  %v387_v5 = vld [vmem:[%s2698_s1 + $0xb38] sm:$0xff]  ;;  %v1006_v54 = vld [vmem:[%s2700_s3 + $0x40] sm:$0xff] }
  0xfd   :  { %941 = vmatpush.msra.mxu2 %v319_v53  ;;  %957 = vmatpush.msra.mxu0 %v399_v55  ;;  %v303_v6 = vld [vmem:[%s2698_s1 + $0x898] sm:$0xff]  ;;  %v1027_v53 = vld [vmem:[%s2700_s3 + $0xe8] sm:$0xff]  ;;  %v1175_v55 = vld [vmem:[%s2697_s0 + $0x30] sm:$0xff] }
  0xfe   :  { %923 = vmatpush.msra.mxu3 %v247_v58  ;;  %903 = vmatpush.msrb.mxu1 %v183_v61  ;;  %v175_v7 = vld [vmem:[%s2698_s1 + $0x498] sm:$0xff]  ;;  %v531_v58 = vpop.f32.mrf.mxu0 }
  0xff   :  { %942 = vmatpush.msra.mxu2 %v315_v56  ;;  %958 = vmatpush.msra.mxu0 %v395_v59  ;;  %v235_v9 = vld [vmem:[%s2698_s1 + $0x678] sm:$0xff]  ;;  %v1026_v56 = vld [vmem:[%s2700_s3 + $0xe0] sm:$0xff] }
 0x100   :  { %924 = vmatpush.msra.mxu3 %v243_v62  ;;  %904 = vmatpush.msrb.mxu1 %v179_v2  ;;  %v383_v10 = vld [vmem:[%s2698_s1 + $0xb18] sm:$0xff]  ;;  %v571_v61 = vpop.f32.mrf.mxu2  ;;  %v1004_v62 = vld [vmem:[%s2700_s3 + $0x30] sm:$0xff] }
 0x101   :  { %943 = vmatpush.msra.mxu2 %v311_v60  ;;  %959 = vmatpush.msra.mxu0 %v391_v0  ;;  %v171_v12 = vld [vmem:[%s2698_s1 + $0x478] sm:$0xff]  ;;  %v512_v60 = vadd.f32 %v511_v50, %v492_v11  ;;  %v423_v0 = vperm.slane %v2444_v27, 1  ;;  %v1034_v50 = vld [vmem:[%s2700_s3 + $0x120] sm:$0xff] }
 0x102   :  { %925 = vmatpush.msra.mxu3 %v239_v3  ;;  %905 = vmatpush.msrb.mxu1 %v175_v7  ;;  %v231_v13 = vld [vmem:[%s2698_s1 + $0x658] sm:$0xff]  ;;  %v1003_v3 = vld [vmem:[%s2700_s3 + $0x28] sm:$0xff]  ;;  %v1030_v11 = vld [vmem:[%s2700_s3 + $0x100] sm:$0xff] }
 0x103   :  { %944 = vmatpush.msra.mxu2 %v307_v1  ;;  %960 = vmatpush.msra.mxu0 %v387_v5  ;;  %v299_v14 = vld [vmem:[%s2698_s1 + $0x878] sm:$0xff]  ;;  %v1024_v1 = vld [vmem:[%s2700_s3 + $0xd0] sm:$0xff]  ;;  %v532_v2 = vadd.f32 %v531_v58, %v512_v60  ;;  %v591_v5 = vpop.f32.mrf.mxu3  ;;  %v1023_v7 = vld [vmem:[%s2700_s3 + $0xc8] sm:$0xff]  ;;  %v424_v58 = vperm.slane %v2444_v27, 2 }
 0x104   :  { %926 = vmatpush.msra.mxu3 %v235_v9  ;;  %v379_v15 = vld [vmem:[%s2698_s1 + $0xaf8] sm:$0xff]  ;;  %870 = vmatmul.f32.vlgmr.msrb.gmra.mxu2 %v1169_v19  ;;  %v1002_v9 = vld [vmem:[%s2700_s3 + $0x20] sm:$0xff] }
 0x105   :  { %945 = vmatpush.msra.mxu2 %v303_v6  ;;  %961 = vmatpush.msra.mxu0 %v383_v10  ;;  %v167_v18 = vld [vmem:[%s2698_s1 + $0x458] sm:$0xff]  ;;  %v551_v6 = vpop.f32.mrf.mxu1  ;;  %v592_v10 = vadd.f32 %v591_v5, %v423_v0  ;;  %v1055_v0 = vld [vmem:[%s2700_s3 + $0x1c8] sm:$0xff] }
 0x106   :  { %906 = vmatpush.msrb.mxu1 %v171_v12  ;;  %v227_v20 = vld [vmem:[%s2698_s1 + $0x638] sm:$0xff]  ;;  %927 = vmatpush.msra.mxu3 %v231_v13  ;;  %v1022_v12 = vld [vmem:[%s2700_s3 + $0xc0] sm:$0xff]  ;;  %v552_v13 = vadd.f32 %v551_v6, %v532_v2 }
 0x107   :  { %v295_v21 = vld [vmem:[%s2698_s1 + $0x858] sm:$0xff]  ;;  %946 = vmatpush.msra.mxu2 %v299_v14  ;;  %962 = vmatpush.msra.mxu0 %v379_v15 }
 0x108   :  { %v375_v23 = vld [vmem:[%s2698_s1 + $0xad8] sm:$0xff]  ;;  %907 = vmatpush.msrb.mxu1 %v167_v18  ;;  %928 = vmatpush.msra.mxu3 %v227_v20  ;;  %v1000_v18 = vld [vmem:[%s2700_s3 + $0x10] sm:$0xff]  ;;  %v611_v19 = vpop.f32.mrf.mxu2 }
 0x109   :  { %v163_v24 = vld [vmem:[%s2698_s1 + $0x438] sm:$0xff]  ;;  %947 = vmatpush.msra.mxu2 %v295_v21  ;;  %963 = vmatpush.msra.mxu0 %v375_v23  ;;  %v612_v20 = vadd.f32 %v611_v19, %v592_v10  ;;  %v1020_v21 = vld [vmem:[%s2700_s3 + $0xb0] sm:$0xff]  ;;  %v572_v23 = vadd.f32 %v571_v61, %v552_v13  ;;  %v1051_v19 = vld [vmem:[%s2700_s3 + $0x1a8] sm:$0xff] }
 0x10a   :  { %v223_v25 = vld [vmem:[%s2698_s1 + $0x618] sm:$0xff]  ;;  %908 = vmatpush.msrb.mxu1 %v163_v24  ;;  %890 = vmatmul.f32.vlgmr.msrb.gmra.mxu0 %v1172_v22  ;;  %v999_v24 = vld [vmem:[%s2700_s3 + $0x8] sm:$0xff]  ;;  %v1056_v61 = vld [vmem:[%s2700_s3 + $0x1d0] sm:$0xff] }
 0x10b   :  { %v291_v26 = vld [vmem:[%s2698_s1 + $0x838] sm:$0xff]  ;;  %929 = vmatpush.msra.mxu3 %v223_v25  ;;  %v1019_v25 = vld [vmem:[%s2700_s3 + $0xa8] sm:$0xff]  ;;  %v994_v31 = vmax.f32 %v572_v23, 0.0  ;;  %v1052_v13 = vld [vmem:[%s2700_s3 + $0x1b0] sm:$0xff] }
 0x10c   :  { %v371_v28 = vld [vmem:[%s2698_s1 + $0xab8] sm:$0xff]  ;;  %948 = vmatpush.msra.mxu2 %v291_v26  ;;  %v998_v26 = vld [vmem:[%s2700_s3] sm:$0xff] }
 0x10d   :  { %v1013_v29 = vld [vmem:[%s2700_s3 + $0x78] sm:$0xff]  ;;  %964 = vmatpush.msra.mxu0 %v371_v28 }
 0x10e   :  { %v287_v4 = vld [vmem:[%s2698_s1 + $0x818] sm:$0xff]  ;;  %1066 = vmatpush.msrb.mxu3 %v1013_v29 }
 0x10f   :  { %v367_v30 = vld [vmem:[%s2698_s1 + $0xa98] sm:$0xff]  ;;  %949 = vmatpush.msra.mxu2 %v287_v4 }
 0x110   :  { %v1170_v32 = vld [vmem:[%s2697_s0 + $0x18] sm:$0xff]  ;;  %965 = vmatpush.msra.mxu0 %v367_v30  ;;  %950 = vmatmul.f32.vlgmr.msra.gmra.mxu2 %v1171_v36  ;;  %v1018_v30 = vld [vmem:[%s2700_s3 + $0xa0] sm:$0xff] }
 0x111   :  { %930 = vmatmul.f32.vlgmr.msra.gmra.mxu3 %v1170_v32  ;;  %v159_v35 = vld [vmem:[%s2698_s1 + $0x418] sm:$0xff] }
 0x112   :  { %v363_v8 = vld [vmem:[%s2698_s1 + $0xa78] sm:$0xff]  ;;  %1067 = vmatpush.msrb.mxu3 %v1012_v33  ;;  %909 = vmatpush.msrb.mxu1 %v159_v35  ;;  %v1016_v35 = vld [vmem:[%s2700_s3 + $0x90] sm:$0xff] }
 0x113   :  { %v419_v38 = vld [vmem:[%s2698_s1 + $0xc38] sm:$0xff]  ;;  %966 = vmatpush.msra.mxu0 %v363_v8  ;;  %910 = vmatmul.f32.vlgmr.msrb.gmra.mxu1 %v1173_v42  ;;  %v1044_v42 = vld [vmem:[%s2700_s3 + $0x170] sm:$0xff] }
 0x114   :  { %v359_v39 = vld [vmem:[%s2698_s1 + $0xa58] sm:$0xff]  ;;  %1068 = vmatpush.msrb.mxu3 %v1011_v37  ;;  %988 = vmatpush.msra.mxu1 %v419_v38  ;;  %v1015_v37 = vld [vmem:[%s2700_s3 + $0x88] sm:$0xff] }
 0x115   :  { %v355_v43 = vld [vmem:[%s2698_s1 + $0xa38] sm:$0xff]  ;;  %967 = vmatpush.msra.mxu0 %v359_v39  ;;  %v1014_v39 = vld [vmem:[%s2700_s3 + $0x80] sm:$0xff] }
 0x116   :  { %v415_v16 = vld [vmem:[%s2698_s1 + $0xc18] sm:$0xff]  ;;  %1069 = vmatpush.msrb.mxu3 %v1010_v63 }
 0x117   :  { %v1009_v44 = vld [vmem:[%s2700_s3 + $0x58] sm:$0xff]  ;;  %968 = vmatpush.msra.mxu0 %v355_v43  ;;  %989 = vmatpush.msra.mxu1 %v415_v16  ;;  %v1043_v43 = vld [vmem:[%s2700_s3 + $0x168] sm:$0xff]  ;;  %v1042_v16 = vld [vmem:[%s2700_s3 + $0x160] sm:$0xff] }
 0x118   :  { %v1029_v45 = vld [vmem:[%s2700_s3 + $0xf8] sm:$0xff]  ;;  %1070 = vmatpush.msrb.mxu3 %v1009_v44 }
 0x119   :  { %v351_v17 = vld [vmem:[%s2698_s1 + $0xa18] sm:$0xff]  ;;  %1086 = vmatpush.msrb.mxu1 %v1029_v45  ;;  %v1040_v45 = vld [vmem:[%s2700_s3 + $0x150] sm:$0xff] }
 0x11a   :  { %969 = vmatpush.msra.mxu0 %v351_v17  ;;  %1071 = vmatpush.msrb.mxu3 %v1008_v48  ;;  %v1005_v57 = vld [vmem:[%s2700_s3 + $0x38] sm:$0xff]  ;;  %v1039_v17 = vld [vmem:[%s2700_s3 + $0x148] sm:$0xff]  ;;  %v1036_v48 = vld [vmem:[%s2700_s3 + $0x130] sm:$0xff] }
 0x11b   :  { %970 = vmatmul.f32.vlgmr.msra.gmra.mxu0 %v1174_v52  ;;  %1087 = vmatpush.msrb.mxu1 %v1028_v49  ;;  %v1025_v59 = vld [vmem:[%s2700_s3 + $0xd8] sm:$0xff]  ;;  %v1035_v49 = vld [vmem:[%s2700_s3 + $0x128] sm:$0xff]  ;;  %v1032_v52 = vld [vmem:[%s2700_s3 + $0x110] sm:$0xff] }
 0x11c   :  { %1166 = vmatmul.msk.f32.vlgmr.msra.gmra.mxu1 %vm430_vm0, %v1175_v55  ;;  %1072 = vmatpush.msrb.mxu3 %v1007_v51  ;;  %v1001_v14 = vld [vmem:[%s2700_s3 + $0x18] sm:$0xff]  ;;  %v1060_v55 = vld [vmem:[%s2700_s3 + $0x1f0] sm:$0xff] }
 0x11d   :  { %1088 = vmatpush.msrb.mxu1 %v1027_v53  ;;  %v1021_v15 = vld [vmem:[%s2700_s3 + $0xb8] sm:$0xff]  ;;  %v1031_v53 = vld [vmem:[%s2700_s3 + $0x108] sm:$0xff] }
 0x11e   :  { %1073 = vmatpush.msrb.mxu3 %v1006_v54  ;;  %v1017_v33 = vld [vmem:[%s2700_s3 + $0x98] sm:$0xff] }
 0x11f   :  { %1089 = vmatpush.msrb.mxu1 %v1026_v56  ;;  %v651_v32 = vpop.f32.mrf.mxu1  ;;  %v1045_v41 = vld [vmem:[%s2700_s3 + $0x178] sm:$0xff]  ;;  %v1059_v56 = vld [vmem:[%s2700_s3 + $0x1e8] sm:$0xff] }
 0x120   :  { %1074 = vmatpush.msrb.mxu3 %v1005_v57  ;;  %1106 = vmatpush.msrb.mxu2 %v1045_v41  ;;  %v1041_v44 = vld [vmem:[%s2700_s3 + $0x158] sm:$0xff]  ;;  %v1058_v57 = vld [vmem:[%s2700_s3 + $0x1e0] sm:$0xff] }
 0x121   :  { %1090 = vmatpush.msrb.mxu1 %v1025_v59  ;;  %v1037_v47 = vld [vmem:[%s2700_s3 + $0x138] sm:$0xff] }
 0x122   :  { %1075 = vmatpush.msrb.mxu3 %v1004_v62  ;;  %1107 = vmatpush.msrb.mxu2 %v1044_v42  ;;  %v1033_v51 = vld [vmem:[%s2700_s3 + $0x118] sm:$0xff] }
 0x123   :  { %1091 = vmatpush.msrb.mxu1 %v1024_v1  ;;  %v1061_v54 = vld [vmem:[%s2700_s3 + $0x1f8] sm:$0xff] }
 0x124   :  { %1076 = vmatpush.msrb.mxu3 %v1003_v3  ;;  %1108 = vmatpush.msrb.mxu2 %v1043_v43  ;;  %v1057_v59 = vld [vmem:[%s2700_s3 + $0x1d8] sm:$0xff] }
 0x125   :  { %1092 = vmatpush.msrb.mxu1 %v1023_v7  ;;  %1126 = vmatpush.msrb.mxu0 %v1061_v54  ;;  %v1054_v7 = vld [vmem:[%s2700_s3 + $0x1c0] sm:$0xff]  ;;  %v1053_v10 = vld [vmem:[%s2700_s3 + $0x1b8] sm:$0xff] }
 0x126   :  { %1077 = vmatpush.msrb.mxu3 %v1002_v9  ;;  %v671_v29 = vpop.f32.mrf.mxu3  ;;  %1109 = vmatpush.msrb.mxu2 %v1042_v16 }
 0x127   :  { %1093 = vmatpush.msrb.mxu1 %v1022_v12  ;;  %1127 = vmatpush.msrb.mxu0 %v1060_v55 }
 0x128   :  { %1078 = vmatpush.msrb.mxu3 %v1001_v14  ;;  %v631_v28 = vpop.f32.mrf.mxu0  ;;  %1110 = vmatpush.msrb.mxu2 %v1041_v44 }
 0x129   :  { %1094 = vmatpush.msrb.mxu1 %v1021_v15  ;;  %v632_v4 = vadd.f32 %v631_v28, %v612_v20  ;;  %1128 = vmatpush.msrb.mxu0 %v1059_v56  ;;  %v1047_v28 = vld [vmem:[%s2700_s3 + $0x188] sm:$0xff] }
 0x12a   :  { %1079 = vmatpush.msrb.mxu3 %v1000_v18  ;;  %1111 = vmatpush.msrb.mxu2 %v1040_v45 }
 0x12b   :  { %1095 = vmatpush.msrb.mxu1 %v1020_v21  ;;  %v652_v34 = vadd.f32 %v651_v32, %v632_v4  ;;  %1129 = vmatpush.msrb.mxu0 %v1058_v57  ;;  %v1050_v21 = vld [vmem:[%s2700_s3 + $0x1a0] sm:$0xff]  ;;  %v425_v4 = vperm.slane %v2444_v27, 3 }
 0x12c   :  { %1080 = vmatpush.msrb.mxu3 %v999_v24  ;;  %1112 = vmatpush.msrb.mxu2 %v1039_v17  ;;  %v1049_v24 = vld [vmem:[%s2700_s3 + $0x198] sm:$0xff]  ;;  %v1168_v27 = vld [vmem:[%s2701_s4] ss:$0 sm:$0xff] }
 0x12d   :  { %1096 = vmatpush.msrb.mxu1 %v1019_v25  ;;  %v672_v8 = vadd.f32 %v671_v29, %v652_v34  ;;  %1130 = vmatpush.msrb.mxu0 %v1057_v59  ;;  %v1046_v29 = vld [vmem:[%s2700_s3 + $0x180] sm:$0xff] }
 0x12e   :  { %1081 = vmatpush.msrb.mxu3 %v998_v26  ;;  %v691_v36 = vpop.f32.mrf.mxu2  ;;  %1113 = vmatpush.msrb.mxu2 %v1038_v46  ;;  %v1048_v26 = vld [vmem:[%s2700_s3 + $0x190] sm:$0xff] }
 0x12f   :  { %1082 = vmatmul.f32.vlgmr.msrb.gmra.mxu3 %v994_v31  ;;  %1097 = vmatpush.msrb.mxu1 %v1018_v30  ;;  %v692_v22 = vadd.f32 %v691_v36, %v672_v8 }
 0x130   :  { %v711_v38 = vpop.f32.mrf.mxu3  ;;  %1114 = vmatpush.msrb.mxu2 %v1037_v47  ;;  %1131 = vmatpush.msrb.mxu0 %v1056_v61 }
 0x131   :  { %1098 = vmatpush.msrb.mxu1 %v1017_v33  ;;  %v712_v40 = vadd.f32 %v711_v38, %v692_v22 }
 0x132   :  { %1115 = vmatpush.msrb.mxu2 %v1036_v48  ;;  %1132 = vmatpush.msrb.mxu0 %v1055_v0 }
 0x133   :  { %1099 = vmatpush.msrb.mxu1 %v1016_v35  ;;  %v995_v63 = vmax.f32 %v712_v40, 0.0 }
 0x134   :  { %1116 = vmatpush.msrb.mxu2 %v1035_v49  ;;  %1133 = vmatpush.msrb.mxu0 %v1054_v7 }
 0x135   :  { %1100 = vmatpush.msrb.mxu1 %v1015_v37 }
 0x136   :  { %1117 = vmatpush.msrb.mxu2 %v1034_v50  ;;  %1134 = vmatpush.msrb.mxu0 %v1053_v10 }
 0x137   :  { %1101 = vmatpush.msrb.mxu1 %v1014_v39 }
 0x138   :  { %1102 = vmatmul.f32.vlgmr.msrb.gmra.mxu1 %v995_v63  ;;  %1118 = vmatpush.msrb.mxu2 %v1033_v51 }
 0x139   :  { %1135 = vmatpush.msrb.mxu0 %v1052_v13 }
 0x13a   :  { %1119 = vmatpush.msrb.mxu2 %v1032_v52 }
 0x13b   :  { %1136 = vmatpush.msrb.mxu0 %v1051_v19 }
 0x13c   :  { %1120 = vmatpush.msrb.mxu2 %v1031_v53 }
 0x13d   :  { %1137 = vmatpush.msrb.mxu0 %v1050_v21 }
 0x13e   :  { %1121 = vmatpush.msrb.mxu2 %v1030_v11 }
 0x13f   :  { %1138 = vmatpush.msrb.mxu0 %v1049_v24 }
 0x141   :  { %1139 = vmatpush.msrb.mxu0 %v1048_v26 }
 0x143   :  { %1140 = vmatpush.msrb.mxu0 %v1047_v28 }
 0x145   :  { %1141 = vmatpush.msrb.mxu0 %v1046_v29 }
 0x14c   :  { %v751_v1 = vpop.f32.mrf.mxu3 }
 0x14d   :  { %v731_v60 = vpop.f32.mrf.mxu1 }
 0x14e   :  { %v732_v62 = vadd.f32 %v731_v60, %v424_v58 }
 0x150   :  { %v752_v2 = vadd.f32 %v751_v1, %v732_v62 }
 0x152   :  { %v771_v3 = vpop.f32.mrf.mxu0 }
 0x153   :  { %v772_v5 = vadd.f32 %v771_v3, %v752_v2  ;;  %v791_v6 = vpop.f32.mrf.mxu2 }
 0x155   :  { %v792_v12 = vadd.f32 %v791_v6, %v772_v5 }
 0x165   :  { %v811_v9 = vpop.f32.mrf.mxu1 }
 0x166   :  { %v812_v14 = vadd.f32 %v811_v9, %v792_v12 }
 0x16b   :  { %v851_v18 = vpop.f32.mrf.mxu0 }
 0x16e   :  { %v831_v15 = vpop.f32.mrf.mxu3 }
 0x16f   :  { %v832_v20 = vadd.f32 %v831_v15, %v812_v14 }
 0x171   :  { %v852_v23 = vadd.f32 %v851_v18, %v832_v20 }
 0x173   :  { %v996_v25 = vmax.f32 %v852_v23, 0.0 }
 0x175   :  { %1122 = vmatmul.f32.vlgmr.msrb.gmra.mxu2 %v996_v25 }
 0x187   :  { %v871_v30 = vpop.f32.mrf.mxu2  ;;  %v891_v32 = vpop.f32.mrf.mxu0 }
 0x188   :  { %v872_v31 = vadd.f32 %v871_v30, %v425_v4 }
 0x18a   :  { %v892_v33 = vadd.f32 %v891_v32, %v872_v31 }
 0x190   :  { %v911_v34 = vpop.f32.mrf.mxu1 }
 0x191   :  { %v912_v35 = vadd.f32 %v911_v34, %v892_v33 }
 0x193   :  { %v951_v37 = vpop.f32.mrf.mxu2 }
 0x194   :  { %v931_v8 = vpop.f32.mrf.mxu3 }
 0x195   :  { %v932_v36 = vadd.f32 %v931_v8, %v912_v35 }
 0x197   :  { %v952_v22 = vadd.f32 %v951_v37, %v932_v36 }
 0x198   :  { %v971_v38 = vpop.f32.mrf.mxu0 }
 0x199   :  { %v972_v39 = vadd.f32 %v971_v38, %v952_v22  ;;  %v991_v40 = vpop.f32.mrf.mxu1 }
 0x19b   :  { %v992_v63 = vadd.f32 %v991_v40, %v972_v39 }
 0x19d   :  { %v997_v41 = vmax.f32 %v992_v63, 0.0 }
 0x19f   :  { %1142 = vmatmul.f32.vlgmr.msrb.gmra.mxu0 %v997_v41 }
 0x1b2   :  { %v1083_v42 = vpop.f32.mrf.mxu3 }
 0x1b3   :  { %v1084_v16 = vadd.f32 %v1168_v27, %v1083_v42 }
 0x1b5   :  { %v1103_v43 = vpop.f32.mrf.mxu1 }
 0x1b6   :  { %v1104_v45 = vadd.f32 %v1103_v43, %v1084_v16 }
 0x1f8   :  { %v1123_v44 = vpop.f32.mrf.mxu2 }
 0x1f9   :  { %v1124_v17 = vadd.f32 %v1123_v44, %v1104_v45 }
 0x21c   :  { %v1143_v46 = vpop.f32.mrf.mxu0 }
 0x21d   :  { %v1144_v47 = vadd.f32 %v1143_v46, %v1124_v17 }
 0x21f   :  { %1146 = vst [vmem:[#allocation2] sm:$0xff] %v1144_v47 }
 0x220   :  { %1157 = dma.vmem_to_hbm [thread:$0]  %s1153_s22, 128, %s1155_s25, [#allocation3]  }
 0x221   :  { %1200 = dma.done.wait [#allocation3], 128  }
 0x222   :  { %1201 = vsyncadd [#allocation3], 4294967168 }
 0x223   :  { %1162 = vsyncpa [#allocation3], 1 }

</bundles_post_ra>
